<compile_context>
chip_gen: v5e
topology: v5e:2x2
jax: 0.10.0
libtpu: 0.0.40
codegen_flags: <defaults>
</compile_context>

<pallas_src>
import functools
import math

import numpy as np
import jax
import jax.numpy as jnp
from jax.experimental import pallas as pl
from jax.experimental.pallas import tpu as pltpu


# ---------------------------------------------------------------------------
# Mask construction (matches PyramidalAttention._generate_masks exactly).
# Used only by the pure-JAX reference; the kernel regenerates the mask from
# index arithmetic on the fly.
# ---------------------------------------------------------------------------
def generate_masks(n_heads: int, seq_len: int) -> np.ndarray:
    n_dil = min(5, n_heads)
    masks = np.zeros((n_dil, seq_len, seq_len), dtype=np.float32)
    i = np.arange(seq_len)[:, None]
    j = np.arange(seq_len)[None, :]
    dist = np.abs(i - j)
    for h in range(n_dil):
        dilation = 2 ** h
        m = (dist <= dilation) | (dist % (2 ** (1 + h)) == 0)
        masks[h] = m.astype(np.float32)
    head_idx = np.minimum(np.arange(n_heads), n_dil - 1)
    return masks[head_idx]  # (n_heads, seq_len, seq_len)


# ---------------------------------------------------------------------------
# Pallas kernel: one batch element per grid step.
# ---------------------------------------------------------------------------
def _pyramidal_attention_kernel(x_ref, wqkv_ref, bqkv_ref, wo_ref, bo_ref, o_ref,
                                *, n_heads, head_dim, n_dil):
    H, D = n_heads, head_dim
    S = x_ref.shape[1]
    E = x_ref.shape[2]

    x = x_ref[0].astype(jnp.bfloat16)                                   # (S, E)

    # (1) Fused Q/K/V projection: one (S,E)@(E,3E) matmul, full MXU column
    #     occupancy.  The 1/sqrt(D) score scale is already folded into the Q
    #     columns / Q bias by the wrapper.  f32 accumulation + f32 bias add.
    qkv = jnp.dot(x, wqkv_ref[...],
                  preferred_element_type=jnp.float32) + bqkv_ref[...]   # (S, 3E)

    # (2) Log-sparse pyramidal masks from pure index arithmetic: a single
    #     (S,S) |i-j| and only n_dil (<=5) distinct keep masks, shared across
    #     the head group with the same dilation.
    qi = jax.lax.broadcasted_iota(jnp.int32, (S, S), 0)
    kj = jax.lax.broadcasted_iota(jnp.int32, (S, S), 1)
    dist = jnp.abs(qi - kj)
    keeps = []
    for g in range(n_dil):
        dil = 1 << g
        keeps.append((dist <= dil) | ((dist & (2 * dil - 1)) == 0))     # (S, S)

    neg = jnp.float32(-1e30)   # finite; diagonal always kept -> no NaN path

    # (3) Per-head attention.  The score / probs@V matmuls are inherently
    #     per-head (K = N = head_dim); softmax stays f32 and its
    #     normalization is deferred onto the (S, D) context.
    head_ctx = []
    for h in range(H):
        q_h = qkv[:, h * D:(h + 1) * D].astype(jnp.bfloat16)            # (S, D)
        k_h = qkv[:, E + h * D:E + (h + 1) * D].astype(jnp.bfloat16)    # (S, D)
        v_h = qkv[:, 2 * E + h * D:2 * E + (h + 1) * D].astype(jnp.bfloat16)

        s = jnp.einsum("qd,kd->qk", q_h, k_h,
                       preferred_element_type=jnp.float32)              # (S, S)
        s = jnp.where(keeps[min(h, n_dil - 1)], s, neg)

        m = jnp.max(s, axis=-1, keepdims=True)
        p = jnp.exp(s - m)
        denom = jnp.sum(p, axis=-1, keepdims=True)                      # (S, 1)
        # TODO(synk): training-mode dropout on p (eval semantics: identity).
        c = jnp.einsum("qk,kd->qd", p.astype(jnp.bfloat16), v_h,
                       preferred_element_type=jnp.float32)              # (S, D)
        head_ctx.append(c * pl.reciprocal(denom, approx=True))

    # (4) Output projection fused over heads: concat(heads) @ Wo as ONE K=E
    #     matmul (no (H,S,E) intermediate, no axis-0 reduction).
    ctx = jnp.concatenate(head_ctx, axis=-1).astype(jnp.bfloat16)       # (S, E)
    out = jnp.dot(ctx, wo_ref[...],
                  preferred_element_type=jnp.float32) + bo_ref[...]     # (S, E)
    o_ref[0] = out.astype(o_ref.dtype)


def pyramidal_attention(x, wq, bq, wk, bk, wv, bv, wo, bo, *, n_heads, head_dim):
    """x: (B, S, E); wq/wk/wv: (H, E, D); bq/bk/bv: (H, 1, D); wo: (E, E); bo: (1, E)."""
    B, S, E = x.shape
    H, D = n_heads, head_dim
    n_dil = min(5, n_heads)
    scale = 1.0 / math.sqrt(head_dim)

    # Fold 1/sqrt(D) into the query projection (exact up to bf16 rounding) and
    # fuse Q/K/V into a single (E, 3*H*D) weight + (1, 3*H*D) bias so the
    # kernel runs one full-width projection matmul.
    cat_w = lambda w: jnp.transpose(w, (1, 0, 2)).reshape(E, H * D)   # (H,E,D)->(E,HD)
    cat_b = lambda b: jnp.transpose(b, (1, 0, 2)).reshape(1, H * D)   # (H,1,D)->(1,HD)
    wqkv = jnp.concatenate([cat_w(wq) * scale, cat_w(wk), cat_w(wv)],
                           axis=-1).astype(jnp.bfloat16)              # (E, 3E) bf16
    bqkv = jnp.concatenate([cat_b(bq) * scale, cat_b(bk), cat_b(bv)],
                           axis=-1)                                   # (1, 3E) f32
    wo_b = wo.astype(jnp.bfloat16)                                    # (E, E)  bf16

    kernel = functools.partial(_pyramidal_attention_kernel,
                               n_heads=H, head_dim=D, n_dil=n_dil)

    def build(single_buffer_weights):
        mode = pl.Buffered(1) if single_buffer_weights else None
        # Grid-invariant weights/biases: constant index_map (+ single
        # buffering when supported) -> no per-step re-DMA, half the VMEM.
        const = lambda shape: pl.BlockSpec(shape, lambda b: (0,) * len(shape),
                                           pipeline_mode=mode)
        return pl.pallas_call(
            kernel,
            out_shape=jax.ShapeDtypeStruct((B, S, E), jnp.float32),
            grid_spec=pltpu.PrefetchScalarGridSpec(
                num_scalar_prefetch=0,
                # TODO(synk): at real S, add (q-tile, kv-tile) grid axes with a
                # flash-style online softmax and a scalar-prefetched block
                # index table skipping fully-masked key blocks (O(S log S)),
                # which also provides a second "parallel" axis for v7x.
                grid=(B,),
                in_specs=[
                    pl.BlockSpec((1, S, E), lambda b: (b, 0, 0)),   # x
                    const((E, 3 * E)),                              # fused Wqkv (bf16)
                    const((1, 3 * E)),                              # fused bqkv (f32)
                    const((E, E)),                                  # Wo (bf16)
                    const((1, E)),                                  # bo (f32)
                ],
                out_specs=pl.BlockSpec((1, S, E), lambda b: (b, 0, 0)),
            ),
            compiler_params=pltpu.CompilerParams(
                dimension_semantics=("parallel",),
                # 48 MiB fits every generation (v7x physical VMEM is 64 MiB);
                # raise toward ~100 MiB on v5e/v6e once flash tiling lands.
                vmem_limit_bytes=48 * 1024 * 1024,
            ),
        )

    args = (x, wqkv, bqkv, wo_b, bo)
    try:
        return build(True)(*args)
    except Exception:
        # Fallback for jax versions that reject pipeline_mode=pl.Buffered(1).
        return build(False)(*args)


# ---------------------------------------------------------------------------
# Pure-JAX reference (mirrors the PyTorch forward in eval mode, full f32).
# ---------------------------------------------------------------------------
def reference(x, wq, bq, wk, bk, wv, bv, wo, bo, *, n_heads, head_dim):
    B, S, E = x.shape
    masks = jnp.asarray(generate_masks(n_heads, S))
    outs = []
    for h in range(n_heads):
        q = x @ wq[h] + bq[h]
        k = x @ wk[h] + bk[h]
        v = x @ wv[h] + bv[h]
        s = jnp.einsum("bqd,bkd->bqk", q, k) / math.sqrt(head_dim)
        s = jnp.where(masks[h][None] == 0.0, -jnp.inf, s)
        p = jax.nn.softmax(s, axis=-1)
        outs.append(jnp.einsum("bqk,bkd->bqd", p, v))
    concat = jnp.concatenate(outs, axis=-1)
    return concat @ wo + bo


if __name__ == "__main__":
    # Small shapes consistent with the module: batch=2, seq=8, embedding=64, heads=8
    B, S, E, H = 2, 8, 64, 8
    D = E // H

    key = jax.random.PRNGKey(0)
    ks = jax.random.split(key, 9)
    init = lambda k, shape: jax.random.normal(k, shape, dtype=jnp.float32) * 0.05

    x  = jax.random.normal(ks[0], (B, S, E), dtype=jnp.float32)
    wq = init(ks[1], (H, E, D)); bq = init(ks[2], (H, 1, D))
    wk = init(ks[3], (H, E, D)); bk = init(ks[4], (H, 1, D))
    wv = init(ks[5], (H, E, D)); bv = init(ks[6], (H, 1, D))
    wo = init(ks[7], (E, E));    bo = init(ks[8], (1, E))

    out = pyramidal_attention(x, wq, bq, wk, bk, wv, bv, wo, bo,
                              n_heads=H, head_dim=D)
    out = jax.block_until_ready(out)

    ref = reference(x, wq, bq, wk, bk, wv, bv, wo, bo, n_heads=H, head_dim=D)
    # bf16 MXU inputs + approx reciprocal -> loosened tolerance vs pure-f32 ref.
    np.testing.assert_allclose(np.asarray(out), np.asarray(ref),
                               rtol=2e-2, atol=2e-2)
    print("KERNEL_OK")
</pallas_src>

<mosaic_0001>
module attributes {stable_mosaic.version = 11 : i64} {
  func.func @_pyramidal_attention_kernel(%arg0: i32, %arg1: memref<1x8x64xf32, #tpu.memory_space<vmem>>, %arg2: memref<64x192xbf16, #tpu.memory_space<vmem>>, %arg3: memref<1x192xf32, #tpu.memory_space<vmem>>, %arg4: memref<64x64xbf16, #tpu.memory_space<vmem>>, %arg5: memref<1x64xf32, #tpu.memory_space<vmem>>, %arg6: memref<1x8x64xf32, #tpu.memory_space<vmem>>) attributes {dimension_semantics = [#tpu.dimension_semantics<parallel>], iteration_bounds = array<i64: 2>, scalar_prefetch = 0 : i64, scratch_operands = 0 : i64, tpu.core_type = #tpu.core_type<tc>, window_params = [{transform_indices = @transform_0, window_bounds = array<i64: 1, 8, 64>}, {pipeline_mode = #tpu.pipeline_mode<synchronous>, transform_indices = @transform_1, window_bounds = array<i64: 64, 192>}, {pipeline_mode = #tpu.pipeline_mode<synchronous>, transform_indices = @transform_2, window_bounds = array<i64: 1, 192>}, {pipeline_mode = #tpu.pipeline_mode<synchronous>, transform_indices = @transform_3, window_bounds = array<i64: 64, 64>}, {pipeline_mode = #tpu.pipeline_mode<synchronous>, transform_indices = @transform_4, window_bounds = array<i64: 1, 64>}, {transform_indices = @transform_5, window_bounds = array<i64: 1, 8, 64>}]} {
    %c0 = arith.constant 0 : index
    %c0_0 = arith.constant 0 : index
    %c0_1 = arith.constant 0 : index
    %0 = vector.load %arg1[%c0, %c0_0, %c0_1] : memref<1x8x64xf32, #tpu.memory_space<vmem>>, vector<1x8x64xf32>
    %1 = vector.shape_cast %0 : vector<1x8x64xf32> to vector<8x64xf32>
    %2 = arith.truncf %1 : vector<8x64xf32> to vector<8x64xbf16>
    %c0_2 = arith.constant 0 : index
    %c0_3 = arith.constant 0 : index
    %3 = vector.load %arg2[%c0_2, %c0_3] : memref<64x192xbf16, #tpu.memory_space<vmem>>, vector<64x192xbf16>
    %cst = arith.constant dense<0.000000e+00> : vector<8x192xf32>
    %4 = tpu.matmul %2, %3, %cst {dimension_numbers = #tpu.dot_dimension_numbers<[1], [0], [0], [1], [0, 0, 1, 1], [], []>} : vector<8x64xbf16>, vector<64x192xbf16>, vector<8x192xf32> -> vector<8x192xf32>
    %c0_4 = arith.constant 0 : index
    %c0_5 = arith.constant 0 : index
    %5 = vector.load %arg3[%c0_4, %c0_5] : memref<1x192xf32, #tpu.memory_space<vmem>>, vector<1x192xf32>
    %6 = vector.broadcast %5 : vector<1x192xf32> to vector<8x192xf32>
    %7 = arith.addf %4, %6 : vector<8x192xf32>
    %8 = tpu.iota {dimensions = array<i32: 0>} : vector<8x8xi32>
    %9 = tpu.iota {dimensions = array<i32: 1>} : vector<8x8xi32>
    %10 = arith.subi %8, %9 : vector<8x8xi32>
    %11 = math.absi %10 : vector<8x8xi32>
    %c1_i32 = arith.constant 1 : i32
    %12 = vector.broadcast %c1_i32 : i32 to vector<8x8xi32>
    %13 = arith.cmpi sle, %11, %12 : vector<8x8xi32>
    %c1_i32_6 = arith.constant 1 : i32
    %14 = vector.broadcast %c1_i32_6 : i32 to vector<8x8xi32>
    %15 = arith.andi %11, %14 : vector<8x8xi32>
    %c0_i32 = arith.constant 0 : i32
    %16 = vector.broadcast %c0_i32 : i32 to vector<8x8xi32>
    %17 = arith.cmpi eq, %15, %16 : vector<8x8xi32>
    %18 = arith.ori %13, %17 : vector<8x8xi1>
    %c2_i32 = arith.constant 2 : i32
    %19 = vector.broadcast %c2_i32 : i32 to vector<8x8xi32>
    %20 = arith.cmpi sle, %11, %19 : vector<8x8xi32>
    %c3_i32 = arith.constant 3 : i32
    %21 = vector.broadcast %c3_i32 : i32 to vector<8x8xi32>
    %22 = arith.andi %11, %21 : vector<8x8xi32>
    %c0_i32_7 = arith.constant 0 : i32
    %23 = vector.broadcast %c0_i32_7 : i32 to vector<8x8xi32>
    %24 = arith.cmpi eq, %22, %23 : vector<8x8xi32>
    %25 = arith.ori %20, %24 : vector<8x8xi1>
    %c4_i32 = arith.constant 4 : i32
    %26 = vector.broadcast %c4_i32 : i32 to vector<8x8xi32>
    %27 = arith.cmpi sle, %11, %26 : vector<8x8xi32>
    %c7_i32 = arith.constant 7 : i32
    %28 = vector.broadcast %c7_i32 : i32 to vector<8x8xi32>
    %29 = arith.andi %11, %28 : vector<8x8xi32>
    %c0_i32_8 = arith.constant 0 : i32
    %30 = vector.broadcast %c0_i32_8 : i32 to vector<8x8xi32>
    %31 = arith.cmpi eq, %29, %30 : vector<8x8xi32>
    %32 = arith.ori %27, %31 : vector<8x8xi1>
    %c8_i32 = arith.constant 8 : i32
    %33 = vector.broadcast %c8_i32 : i32 to vector<8x8xi32>
    %34 = arith.cmpi sle, %11, %33 : vector<8x8xi32>
    %c15_i32 = arith.constant 15 : i32
    %35 = vector.broadcast %c15_i32 : i32 to vector<8x8xi32>
    %36 = arith.andi %11, %35 : vector<8x8xi32>
    %c0_i32_9 = arith.constant 0 : i32
    %37 = vector.broadcast %c0_i32_9 : i32 to vector<8x8xi32>
    %38 = arith.cmpi eq, %36, %37 : vector<8x8xi32>
    %39 = arith.ori %34, %38 : vector<8x8xi1>
    %c16_i32 = arith.constant 16 : i32
    %40 = vector.broadcast %c16_i32 : i32 to vector<8x8xi32>
    %41 = arith.cmpi sle, %11, %40 : vector<8x8xi32>
    %c31_i32 = arith.constant 31 : i32
    %42 = vector.broadcast %c31_i32 : i32 to vector<8x8xi32>
    %43 = arith.andi %11, %42 : vector<8x8xi32>
    %c0_i32_10 = arith.constant 0 : i32
    %44 = vector.broadcast %c0_i32_10 : i32 to vector<8x8xi32>
    %45 = arith.cmpi eq, %43, %44 : vector<8x8xi32>
    %46 = arith.ori %41, %45 : vector<8x8xi1>
    %47 = vector.extract_strided_slice %7 {offsets = [0, 0], sizes = [8, 8], strides = [1, 1]} : vector<8x192xf32> to vector<8x8xf32>
    %48 = arith.truncf %47 : vector<8x8xf32> to vector<8x8xbf16>
    %49 = vector.extract_strided_slice %7 {offsets = [0, 64], sizes = [8, 8], strides = [1, 1]} : vector<8x192xf32> to vector<8x8xf32>
    %50 = arith.truncf %49 : vector<8x8xf32> to vector<8x8xbf16>
    %51 = vector.extract_strided_slice %7 {offsets = [0, 128], sizes = [8, 8], strides = [1, 1]} : vector<8x192xf32> to vector<8x8xf32>
    %52 = arith.truncf %51 : vector<8x8xf32> to vector<8x8xbf16>
    "tpu.trace_start"() <{level = 10 : i32, message = "qd,kd->qk"}> : () -> ()
    %cst_11 = arith.constant dense<0.000000e+00> : vector<8x8xf32>
    %53 = tpu.matmul %48, %50, %cst_11 {dimension_numbers = #tpu.dot_dimension_numbers<[1], [1], [0], [0], [0, 0, 1, 0], [], []>} : vector<8x8xbf16>, vector<8x8xbf16>, vector<8x8xf32> -> vector<8x8xf32>
    %cst_12 = arith.constant -1.000000e+30 : f32
    "tpu.trace_stop"() : () -> ()
    %54 = vector.broadcast %cst_12 : f32 to vector<8x8xf32>
    %55 = arith.select %18, %53, %54 : vector<8x8xi1>, vector<8x8xf32>
    %cst_13 = arith.constant dense<0xFF800000> : vector<8xf32>
    %56 = vector.multi_reduction <maximumf>, %55, %cst_13 [1] : vector<8x8xf32> to vector<8xf32>
    %57 = vector.shape_cast %56 : vector<8xf32> to vector<8x1xf32>
    %58 = vector.broadcast %57 : vector<8x1xf32> to vector<8x8xf32>
    %59 = arith.subf %55, %58 : vector<8x8xf32>
    %60 = math.exp %59 : vector<8x8xf32>
    %cst_14 = arith.constant dense<0.000000e+00> : vector<8xf32>
    %61 = vector.multi_reduction <add>, %60, %cst_14 [1] : vector<8x8xf32> to vector<8xf32>
    %62 = vector.shape_cast %61 : vector<8xf32> to vector<8x1xf32>
    %63 = arith.truncf %60 : vector<8x8xf32> to vector<8x8xbf16>
    "tpu.trace_start"() <{level = 10 : i32, message = "qk,kd->qd"}> : () -> ()
    %cst_15 = arith.constant dense<0.000000e+00> : vector<8x8xf32>
    %64 = tpu.matmul %63, %52, %cst_15 {dimension_numbers = #tpu.dot_dimension_numbers<[1], [0], [0], [1], [0, 0, 1, 1], [], []>} : vector<8x8xbf16>, vector<8x8xbf16>, vector<8x8xf32> -> vector<8x8xf32>
    "tpu.trace_stop"() : () -> ()
    %65 = tpu.reciprocal %62 {approx = true} : vector<8x1xf32> -> vector<8x1xf32>
    %66 = vector.broadcast %65 : vector<8x1xf32> to vector<8x8xf32>
    %67 = arith.mulf %64, %66 : vector<8x8xf32>
    %68 = vector.extract_strided_slice %7 {offsets = [0, 8], sizes = [8, 8], strides = [1, 1]} : vector<8x192xf32> to vector<8x8xf32>
    %69 = arith.truncf %68 : vector<8x8xf32> to vector<8x8xbf16>
    %70 = vector.extract_strided_slice %7 {offsets = [0, 72], sizes = [8, 8], strides = [1, 1]} : vector<8x192xf32> to vector<8x8xf32>
    %71 = arith.truncf %70 : vector<8x8xf32> to vector<8x8xbf16>
    %72 = vector.extract_strided_slice %7 {offsets = [0, 136], sizes = [8, 8], strides = [1, 1]} : vector<8x192xf32> to vector<8x8xf32>
    %73 = arith.truncf %72 : vector<8x8xf32> to vector<8x8xbf16>
    "tpu.trace_start"() <{level = 10 : i32, message = "qd,kd->qk"}> : () -> ()
    %cst_16 = arith.constant dense<0.000000e+00> : vector<8x8xf32>
    %74 = tpu.matmul %69, %71, %cst_16 {dimension_numbers = #tpu.dot_dimension_numbers<[1], [1], [0], [0], [0, 0, 1, 0], [], []>} : vector<8x8xbf16>, vector<8x8xbf16>, vector<8x8xf32> -> vector<8x8xf32>
    %cst_17 = arith.constant -1.000000e+30 : f32
    "tpu.trace_stop"() : () -> ()
    %75 = vector.broadcast %cst_17 : f32 to vector<8x8xf32>
    %76 = arith.select %25, %74, %75 : vector<8x8xi1>, vector<8x8xf32>
    %cst_18 = arith.constant dense<0xFF800000> : vector<8xf32>
    %77 = vector.multi_reduction <maximumf>, %76, %cst_18 [1] : vector<8x8xf32> to vector<8xf32>
    %78 = vector.shape_cast %77 : vector<8xf32> to vector<8x1xf32>
    %79 = vector.broadcast %78 : vector<8x1xf32> to vector<8x8xf32>
    %80 = arith.subf %76, %79 : vector<8x8xf32>
    %81 = math.exp %80 : vector<8x8xf32>
    %cst_19 = arith.constant dense<0.000000e+00> : vector<8xf32>
    %82 = vector.multi_reduction <add>, %81, %cst_19 [1] : vector<8x8xf32> to vector<8xf32>
    %83 = vector.shape_cast %82 : vector<8xf32> to vector<8x1xf32>
    %84 = arith.truncf %81 : vector<8x8xf32> to vector<8x8xbf16>
    "tpu.trace_start"() <{level = 10 : i32, message = "qk,kd->qd"}> : () -> ()
    %cst_20 = arith.constant dense<0.000000e+00> : vector<8x8xf32>
    %85 = tpu.matmul %84, %73, %cst_20 {dimension_numbers = #tpu.dot_dimension_numbers<[1], [0], [0], [1], [0, 0, 1, 1], [], []>} : vector<8x8xbf16>, vector<8x8xbf16>, vector<8x8xf32> -> vector<8x8xf32>
    "tpu.trace_stop"() : () -> ()
    %86 = tpu.reciprocal %83 {approx = true} : vector<8x1xf32> -> vector<8x1xf32>
    %87 = vector.broadcast %86 : vector<8x1xf32> to vector<8x8xf32>
    %88 = arith.mulf %85, %87 : vector<8x8xf32>
    %89 = vector.extract_strided_slice %7 {offsets = [0, 16], sizes = [8, 8], strides = [1, 1]} : vector<8x192xf32> to vector<8x8xf32>
    %90 = arith.truncf %89 : vector<8x8xf32> to vector<8x8xbf16>
    %91 = vector.extract_strided_slice %7 {offsets = [0, 80], sizes = [8, 8], strides = [1, 1]} : vector<8x192xf32> to vector<8x8xf32>
    %92 = arith.truncf %91 : vector<8x8xf32> to vector<8x8xbf16>
    %93 = vector.extract_strided_slice %7 {offsets = [0, 144], sizes = [8, 8], strides = [1, 1]} : vector<8x192xf32> to vector<8x8xf32>
    %94 = arith.truncf %93 : vector<8x8xf32> to vector<8x8xbf16>
    "tpu.trace_start"() <{level = 10 : i32, message = "qd,kd->qk"}> : () -> ()
    %cst_21 = arith.constant dense<0.000000e+00> : vector<8x8xf32>
    %95 = tpu.matmul %90, %92, %cst_21 {dimension_numbers = #tpu.dot_dimension_numbers<[1], [1], [0], [0], [0, 0, 1, 0], [], []>} : vector<8x8xbf16>, vector<8x8xbf16>, vector<8x8xf32> -> vector<8x8xf32>
    %cst_22 = arith.constant -1.000000e+30 : f32
    "tpu.trace_stop"() : () -> ()
    %96 = vector.broadcast %cst_22 : f32 to vector<8x8xf32>
    %97 = arith.select %32, %95, %96 : vector<8x8xi1>, vector<8x8xf32>
    %cst_23 = arith.constant dense<0xFF800000> : vector<8xf32>
    %98 = vector.multi_reduction <maximumf>, %97, %cst_23 [1] : vector<8x8xf32> to vector<8xf32>
    %99 = vector.shape_cast %98 : vector<8xf32> to vector<8x1xf32>
    %100 = vector.broadcast %99 : vector<8x1xf32> to vector<8x8xf32>
    %101 = arith.subf %97, %100 : vector<8x8xf32>
    %102 = math.exp %101 : vector<8x8xf32>
    %cst_24 = arith.constant dense<0.000000e+00> : vector<8xf32>
    %103 = vector.multi_reduction <add>, %102, %cst_24 [1] : vector<8x8xf32> to vector<8xf32>
    %104 = vector.shape_cast %103 : vector<8xf32> to vector<8x1xf32>
    %105 = arith.truncf %102 : vector<8x8xf32> to vector<8x8xbf16>
    "tpu.trace_start"() <{level = 10 : i32, message = "qk,kd->qd"}> : () -> ()
    %cst_25 = arith.constant dense<0.000000e+00> : vector<8x8xf32>
    %106 = tpu.matmul %105, %94, %cst_25 {dimension_numbers = #tpu.dot_dimension_numbers<[1], [0], [0], [1], [0, 0, 1, 1], [], []>} : vector<8x8xbf16>, vector<8x8xbf16>, vector<8x8xf32> -> vector<8x8xf32>
    "tpu.trace_stop"() : () -> ()
    %107 = tpu.reciprocal %104 {approx = true} : vector<8x1xf32> -> vector<8x1xf32>
    %108 = vector.broadcast %107 : vector<8x1xf32> to vector<8x8xf32>
    %109 = arith.mulf %106, %108 : vector<8x8xf32>
    %110 = vector.extract_strided_slice %7 {offsets = [0, 24], sizes = [8, 8], strides = [1, 1]} : vector<8x192xf32> to vector<8x8xf32>
    %111 = arith.truncf %110 : vector<8x8xf32> to vector<8x8xbf16>
    %112 = vector.extract_strided_slice %7 {offsets = [0, 88], sizes = [8, 8], strides = [1, 1]} : vector<8x192xf32> to vector<8x8xf32>
    %113 = arith.truncf %112 : vector<8x8xf32> to vector<8x8xbf16>
    %114 = vector.extract_strided_slice %7 {offsets = [0, 152], sizes = [8, 8], strides = [1, 1]} : vector<8x192xf32> to vector<8x8xf32>
    %115 = arith.truncf %114 : vector<8x8xf32> to vector<8x8xbf16>
    "tpu.trace_start"() <{level = 10 : i32, message = "qd,kd->qk"}> : () -> ()
    %cst_26 = arith.constant dense<0.000000e+00> : vector<8x8xf32>
    %116 = tpu.matmul %111, %113, %cst_26 {dimension_numbers = #tpu.dot_dimension_numbers<[1], [1], [0], [0], [0, 0, 1, 0], [], []>} : vector<8x8xbf16>, vector<8x8xbf16>, vector<8x8xf32> -> vector<8x8xf32>
    %cst_27 = arith.constant -1.000000e+30 : f32
    "tpu.trace_stop"() : () -> ()
    %117 = vector.broadcast %cst_27 : f32 to vector<8x8xf32>
    %118 = arith.select %39, %116, %117 : vector<8x8xi1>, vector<8x8xf32>
    %cst_28 = arith.constant dense<0xFF800000> : vector<8xf32>
    %119 = vector.multi_reduction <maximumf>, %118, %cst_28 [1] : vector<8x8xf32> to vector<8xf32>
    %120 = vector.shape_cast %119 : vector<8xf32> to vector<8x1xf32>
    %121 = vector.broadcast %120 : vector<8x1xf32> to vector<8x8xf32>
    %122 = arith.subf %118, %121 : vector<8x8xf32>
    %123 = math.exp %122 : vector<8x8xf32>
    %cst_29 = arith.constant dense<0.000000e+00> : vector<8xf32>
    %124 = vector.multi_reduction <add>, %123, %cst_29 [1] : vector<8x8xf32> to vector<8xf32>
    %125 = vector.shape_cast %124 : vector<8xf32> to vector<8x1xf32>
    %126 = arith.truncf %123 : vector<8x8xf32> to vector<8x8xbf16>
    "tpu.trace_start"() <{level = 10 : i32, message = "qk,kd->qd"}> : () -> ()
    %cst_30 = arith.constant dense<0.000000e+00> : vector<8x8xf32>
    %127 = tpu.matmul %126, %115, %cst_30 {dimension_numbers = #tpu.dot_dimension_numbers<[1], [0], [0], [1], [0, 0, 1, 1], [], []>} : vector<8x8xbf16>, vector<8x8xbf16>, vector<8x8xf32> -> vector<8x8xf32>
    "tpu.trace_stop"() : () -> ()
    %128 = tpu.reciprocal %125 {approx = true} : vector<8x1xf32> -> vector<8x1xf32>
    %129 = vector.broadcast %128 : vector<8x1xf32> to vector<8x8xf32>
    %130 = arith.mulf %127, %129 : vector<8x8xf32>
    %131 = vector.extract_strided_slice %7 {offsets = [0, 32], sizes = [8, 8], strides = [1, 1]} : vector<8x192xf32> to vector<8x8xf32>
    %132 = arith.truncf %131 : vector<8x8xf32> to vector<8x8xbf16>
    %133 = vector.extract_strided_slice %7 {offsets = [0, 96], sizes = [8, 8], strides = [1, 1]} : vector<8x192xf32> to vector<8x8xf32>
    %134 = arith.truncf %133 : vector<8x8xf32> to vector<8x8xbf16>
    %135 = vector.extract_strided_slice %7 {offsets = [0, 160], sizes = [8, 8], strides = [1, 1]} : vector<8x192xf32> to vector<8x8xf32>
    %136 = arith.truncf %135 : vector<8x8xf32> to vector<8x8xbf16>
    "tpu.trace_start"() <{level = 10 : i32, message = "qd,kd->qk"}> : () -> ()
    %cst_31 = arith.constant dense<0.000000e+00> : vector<8x8xf32>
    %137 = tpu.matmul %132, %134, %cst_31 {dimension_numbers = #tpu.dot_dimension_numbers<[1], [1], [0], [0], [0, 0, 1, 0], [], []>} : vector<8x8xbf16>, vector<8x8xbf16>, vector<8x8xf32> -> vector<8x8xf32>
    %cst_32 = arith.constant -1.000000e+30 : f32
    "tpu.trace_stop"() : () -> ()
    %138 = vector.broadcast %cst_32 : f32 to vector<8x8xf32>
    %139 = arith.select %46, %137, %138 : vector<8x8xi1>, vector<8x8xf32>
    %cst_33 = arith.constant dense<0xFF800000> : vector<8xf32>
    %140 = vector.multi_reduction <maximumf>, %139, %cst_33 [1] : vector<8x8xf32> to vector<8xf32>
    %141 = vector.shape_cast %140 : vector<8xf32> to vector<8x1xf32>
    %142 = vector.broadcast %141 : vector<8x1xf32> to vector<8x8xf32>
    %143 = arith.subf %139, %142 : vector<8x8xf32>
    %144 = math.exp %143 : vector<8x8xf32>
    %cst_34 = arith.constant dense<0.000000e+00> : vector<8xf32>
    %145 = vector.multi_reduction <add>, %144, %cst_34 [1] : vector<8x8xf32> to vector<8xf32>
    %146 = vector.shape_cast %145 : vector<8xf32> to vector<8x1xf32>
    %147 = arith.truncf %144 : vector<8x8xf32> to vector<8x8xbf16>
    "tpu.trace_start"() <{level = 10 : i32, message = "qk,kd->qd"}> : () -> ()
    %cst_35 = arith.constant dense<0.000000e+00> : vector<8x8xf32>
    %148 = tpu.matmul %147, %136, %cst_35 {dimension_numbers = #tpu.dot_dimension_numbers<[1], [0], [0], [1], [0, 0, 1, 1], [], []>} : vector<8x8xbf16>, vector<8x8xbf16>, vector<8x8xf32> -> vector<8x8xf32>
    "tpu.trace_stop"() : () -> ()
    %149 = tpu.reciprocal %146 {approx = true} : vector<8x1xf32> -> vector<8x1xf32>
    %150 = vector.broadcast %149 : vector<8x1xf32> to vector<8x8xf32>
    %151 = arith.mulf %148, %150 : vector<8x8xf32>
    %152 = vector.extract_strided_slice %7 {offsets = [0, 40], sizes = [8, 8], strides = [1, 1]} : vector<8x192xf32> to vector<8x8xf32>
    %153 = arith.truncf %152 : vector<8x8xf32> to vector<8x8xbf16>
    %154 = vector.extract_strided_slice %7 {offsets = [0, 104], sizes = [8, 8], strides = [1, 1]} : vector<8x192xf32> to vector<8x8xf32>
    %155 = arith.truncf %154 : vector<8x8xf32> to vector<8x8xbf16>
    %156 = vector.extract_strided_slice %7 {offsets = [0, 168], sizes = [8, 8], strides = [1, 1]} : vector<8x192xf32> to vector<8x8xf32>
    %157 = arith.truncf %156 : vector<8x8xf32> to vector<8x8xbf16>
    "tpu.trace_start"() <{level = 10 : i32, message = "qd,kd->qk"}> : () -> ()
    %cst_36 = arith.constant dense<0.000000e+00> : vector<8x8xf32>
    %158 = tpu.matmul %153, %155, %cst_36 {dimension_numbers = #tpu.dot_dimension_numbers<[1], [1], [0], [0], [0, 0, 1, 0], [], []>} : vector<8x8xbf16>, vector<8x8xbf16>, vector<8x8xf32> -> vector<8x8xf32>
    %cst_37 = arith.constant -1.000000e+30 : f32
    "tpu.trace_stop"() : () -> ()
    %159 = vector.broadcast %cst_37 : f32 to vector<8x8xf32>
    %160 = arith.select %46, %158, %159 : vector<8x8xi1>, vector<8x8xf32>
    %cst_38 = arith.constant dense<0xFF800000> : vector<8xf32>
    %161 = vector.multi_reduction <maximumf>, %160, %cst_38 [1] : vector<8x8xf32> to vector<8xf32>
    %162 = vector.shape_cast %161 : vector<8xf32> to vector<8x1xf32>
    %163 = vector.broadcast %162 : vector<8x1xf32> to vector<8x8xf32>
    %164 = arith.subf %160, %163 : vector<8x8xf32>
    %165 = math.exp %164 : vector<8x8xf32>
    %cst_39 = arith.constant dense<0.000000e+00> : vector<8xf32>
    %166 = vector.multi_reduction <add>, %165, %cst_39 [1] : vector<8x8xf32> to vector<8xf32>
    %167 = vector.shape_cast %166 : vector<8xf32> to vector<8x1xf32>
    %168 = arith.truncf %165 : vector<8x8xf32> to vector<8x8xbf16>
    "tpu.trace_start"() <{level = 10 : i32, message = "qk,kd->qd"}> : () -> ()
    %cst_40 = arith.constant dense<0.000000e+00> : vector<8x8xf32>
    %169 = tpu.matmul %168, %157, %cst_40 {dimension_numbers = #tpu.dot_dimension_numbers<[1], [0], [0], [1], [0, 0, 1, 1], [], []>} : vector<8x8xbf16>, vector<8x8xbf16>, vector<8x8xf32> -> vector<8x8xf32>
    "tpu.trace_stop"() : () -> ()
    %170 = tpu.reciprocal %167 {approx = true} : vector<8x1xf32> -> vector<8x1xf32>
    %171 = vector.broadcast %170 : vector<8x1xf32> to vector<8x8xf32>
    %172 = arith.mulf %169, %171 : vector<8x8xf32>
    %173 = vector.extract_strided_slice %7 {offsets = [0, 48], sizes = [8, 8], strides = [1, 1]} : vector<8x192xf32> to vector<8x8xf32>
    %174 = arith.truncf %173 : vector<8x8xf32> to vector<8x8xbf16>
    %175 = vector.extract_strided_slice %7 {offsets = [0, 112], sizes = [8, 8], strides = [1, 1]} : vector<8x192xf32> to vector<8x8xf32>
    %176 = arith.truncf %175 : vector<8x8xf32> to vector<8x8xbf16>
    %177 = vector.extract_strided_slice %7 {offsets = [0, 176], sizes = [8, 8], strides = [1, 1]} : vector<8x192xf32> to vector<8x8xf32>
    %178 = arith.truncf %177 : vector<8x8xf32> to vector<8x8xbf16>
    "tpu.trace_start"() <{level = 10 : i32, message = "qd,kd->qk"}> : () -> ()
    %cst_41 = arith.constant dense<0.000000e+00> : vector<8x8xf32>
    %179 = tpu.matmul %174, %176, %cst_41 {dimension_numbers = #tpu.dot_dimension_numbers<[1], [1], [0], [0], [0, 0, 1, 0], [], []>} : vector<8x8xbf16>, vector<8x8xbf16>, vector<8x8xf32> -> vector<8x8xf32>
    %cst_42 = arith.constant -1.000000e+30 : f32
    "tpu.trace_stop"() : () -> ()
    %180 = vector.broadcast %cst_42 : f32 to vector<8x8xf32>
    %181 = arith.select %46, %179, %180 : vector<8x8xi1>, vector<8x8xf32>
    %cst_43 = arith.constant dense<0xFF800000> : vector<8xf32>
    %182 = vector.multi_reduction <maximumf>, %181, %cst_43 [1] : vector<8x8xf32> to vector<8xf32>
    %183 = vector.shape_cast %182 : vector<8xf32> to vector<8x1xf32>
    %184 = vector.broadcast %183 : vector<8x1xf32> to vector<8x8xf32>
    %185 = arith.subf %181, %184 : vector<8x8xf32>
    %186 = math.exp %185 : vector<8x8xf32>
    %cst_44 = arith.constant dense<0.000000e+00> : vector<8xf32>
    %187 = vector.multi_reduction <add>, %186, %cst_44 [1] : vector<8x8xf32> to vector<8xf32>
    %188 = vector.shape_cast %187 : vector<8xf32> to vector<8x1xf32>
    %189 = arith.truncf %186 : vector<8x8xf32> to vector<8x8xbf16>
    "tpu.trace_start"() <{level = 10 : i32, message = "qk,kd->qd"}> : () -> ()
    %cst_45 = arith.constant dense<0.000000e+00> : vector<8x8xf32>
    %190 = tpu.matmul %189, %178, %cst_45 {dimension_numbers = #tpu.dot_dimension_numbers<[1], [0], [0], [1], [0, 0, 1, 1], [], []>} : vector<8x8xbf16>, vector<8x8xbf16>, vector<8x8xf32> -> vector<8x8xf32>
    "tpu.trace_stop"() : () -> ()
    %191 = tpu.reciprocal %188 {approx = true} : vector<8x1xf32> -> vector<8x1xf32>
    %192 = vector.broadcast %191 : vector<8x1xf32> to vector<8x8xf32>
    %193 = arith.mulf %190, %192 : vector<8x8xf32>
    %194 = vector.extract_strided_slice %7 {offsets = [0, 56], sizes = [8, 8], strides = [1, 1]} : vector<8x192xf32> to vector<8x8xf32>
    %195 = arith.truncf %194 : vector<8x8xf32> to vector<8x8xbf16>
    %196 = vector.extract_strided_slice %7 {offsets = [0, 120], sizes = [8, 8], strides = [1, 1]} : vector<8x192xf32> to vector<8x8xf32>
    %197 = arith.truncf %196 : vector<8x8xf32> to vector<8x8xbf16>
    %198 = vector.extract_strided_slice %7 {offsets = [0, 184], sizes = [8, 8], strides = [1, 1]} : vector<8x192xf32> to vector<8x8xf32>
    %199 = arith.truncf %198 : vector<8x8xf32> to vector<8x8xbf16>
    "tpu.trace_start"() <{level = 10 : i32, message = "qd,kd->qk"}> : () -> ()
    %cst_46 = arith.constant dense<0.000000e+00> : vector<8x8xf32>
    %200 = tpu.matmul %195, %197, %cst_46 {dimension_numbers = #tpu.dot_dimension_numbers<[1], [1], [0], [0], [0, 0, 1, 0], [], []>} : vector<8x8xbf16>, vector<8x8xbf16>, vector<8x8xf32> -> vector<8x8xf32>
    %cst_47 = arith.constant -1.000000e+30 : f32
    "tpu.trace_stop"() : () -> ()
    %201 = vector.broadcast %cst_47 : f32 to vector<8x8xf32>
    %202 = arith.select %46, %200, %201 : vector<8x8xi1>, vector<8x8xf32>
    %cst_48 = arith.constant dense<0xFF800000> : vector<8xf32>
    %203 = vector.multi_reduction <maximumf>, %202, %cst_48 [1] : vector<8x8xf32> to vector<8xf32>
    %204 = vector.shape_cast %203 : vector<8xf32> to vector<8x1xf32>
    %205 = vector.broadcast %204 : vector<8x1xf32> to vector<8x8xf32>
    %206 = arith.subf %202, %205 : vector<8x8xf32>
    %207 = math.exp %206 : vector<8x8xf32>
    %cst_49 = arith.constant dense<0.000000e+00> : vector<8xf32>
    %208 = vector.multi_reduction <add>, %207, %cst_49 [1] : vector<8x8xf32> to vector<8xf32>
    %209 = vector.shape_cast %208 : vector<8xf32> to vector<8x1xf32>
    %210 = arith.truncf %207 : vector<8x8xf32> to vector<8x8xbf16>
    "tpu.trace_start"() <{level = 10 : i32, message = "qk,kd->qd"}> : () -> ()
    %cst_50 = arith.constant dense<0.000000e+00> : vector<8x8xf32>
    %211 = tpu.matmul %210, %199, %cst_50 {dimension_numbers = #tpu.dot_dimension_numbers<[1], [0], [0], [1], [0, 0, 1, 1], [], []>} : vector<8x8xbf16>, vector<8x8xbf16>, vector<8x8xf32> -> vector<8x8xf32>
    "tpu.trace_stop"() : () -> ()
    %212 = tpu.reciprocal %209 {approx = true} : vector<8x1xf32> -> vector<8x1xf32>
    %213 = vector.broadcast %212 : vector<8x1xf32> to vector<8x8xf32>
    %214 = arith.mulf %211, %213 : vector<8x8xf32>
    %215 = tpu.concatenate %67, %88, %109, %130, %151, %172, %193, %214 in 1 : vector<8x8xf32>, vector<8x8xf32>, vector<8x8xf32>, vector<8x8xf32>, vector<8x8xf32>, vector<8x8xf32>, vector<8x8xf32>, vector<8x8xf32> -> vector<8x64xf32>
    %216 = arith.truncf %215 : vector<8x64xf32> to vector<8x64xbf16>
    %c0_51 = arith.constant 0 : index
    %c0_52 = arith.constant 0 : index
    %217 = vector.load %arg4[%c0_51, %c0_52] : memref<64x64xbf16, #tpu.memory_space<vmem>>, vector<64x64xbf16>
    %cst_53 = arith.constant dense<0.000000e+00> : vector<8x64xf32>
    %218 = tpu.matmul %216, %217, %cst_53 {dimension_numbers = #tpu.dot_dimension_numbers<[1], [0], [0], [1], [0, 0, 1, 1], [], []>} : vector<8x64xbf16>, vector<64x64xbf16>, vector<8x64xf32> -> vector<8x64xf32>
    %c0_54 = arith.constant 0 : index
    %c0_55 = arith.constant 0 : index
    %219 = vector.load %arg5[%c0_54, %c0_55] : memref<1x64xf32, #tpu.memory_space<vmem>>, vector<1x64xf32>
    %220 = vector.broadcast %219 : vector<1x64xf32> to vector<8x64xf32>
    %221 = arith.addf %218, %220 : vector<8x64xf32>
    %c0_56 = arith.constant 0 : index
    %c0_57 = arith.constant 0 : index
    %c0_58 = arith.constant 0 : index
    %222 = vector.load %arg6[%c0_56, %c0_57, %c0_58] : memref<1x8x64xf32, #tpu.memory_space<vmem>>, vector<1x8x64xf32>
    %223 = vector.shape_cast %222 : vector<1x8x64xf32> to vector<8x64xf32>
    %224 = vector.shape_cast %221 : vector<8x64xf32> to vector<1x8x64xf32>
    tpu.vector_store %arg6[%c0_56, %c0_57, %c0_58], %224 {strides = array<i32>} : memref<1x8x64xf32, #tpu.memory_space<vmem>>, vector<1x8x64xf32>,
    return
  }
  func.func @transform_0(%arg0: i32) -> (i32, i32, i32) {
    %c0_i32 = arith.constant 0 : i32
    %c0_i32_0 = arith.constant 0 : i32
    %c0_i32_1 = arith.constant 0 : i32
    return %arg0, %c0_i32, %c0_i32_0 : i32, i32, i32
  }
  func.func @transform_1(%arg0: i32) -> (i32, i32) {
    %c0_i32 = arith.constant 0 : i32
    %c0_i32_0 = arith.constant 0 : i32
    %c0_i32_1 = arith.constant 0 : i32
    return %c0_i32, %c0_i32_0 : i32, i32
  }
  func.func @transform_2(%arg0: i32) -> (i32, i32) {
    %c0_i32 = arith.constant 0 : i32
    %c0_i32_0 = arith.constant 0 : i32
    %c0_i32_1 = arith.constant 0 : i32
    return %c0_i32, %c0_i32_0 : i32, i32
  }
  func.func @transform_3(%arg0: i32) -> (i32, i32) {
    %c0_i32 = arith.constant 0 : i32
    %c0_i32_0 = arith.constant 0 : i32
    %c0_i32_1 = arith.constant 0 : i32
    return %c0_i32, %c0_i32_0 : i32, i32
  }
  func.func @transform_4(%arg0: i32) -> (i32, i32) {
    %c0_i32 = arith.constant 0 : i32
    %c0_i32_0 = arith.constant 0 : i32
    %c0_i32_1 = arith.constant 0 : i32
    return %c0_i32, %c0_i32_0 : i32, i32
  }
  func.func @transform_5(%arg0: i32) -> (i32, i32, i32) {
    %c0_i32 = arith.constant 0 : i32
    %c0_i32_0 = arith.constant 0 : i32
    %c0_i32_1 = arith.constant 0 : i32
    return %arg0, %c0_i32, %c0_i32_0 : i32, i32, i32
  }
}

module attributes {stable_mosaic.version = 11 : i64} {
  func.func @_pyramidal_attention_kernel(%arg0: i32, %arg1: memref<1x8x64xf32, #tpu.memory_space<vmem>>, %arg2: memref<64x192xbf16, #tpu.memory_space<vmem>>, %arg3: memref<1x192xf32, #tpu.memory_space<vmem>>, %arg4: memref<64x64xbf16, #tpu.memory_space<vmem>>, %arg5: memref<1x64xf32, #tpu.memory_space<vmem>>, %arg6: memref<1x8x64xf32, #tpu.memory_space<vmem>>) attributes {dimension_semantics = [#tpu.dimension_semantics<parallel>], iteration_bounds = array<i64: 2>, scalar_prefetch = 0 : i64, scratch_operands = 0 : i64, tpu.core_type = #tpu.core_type<tc>, window_params = [{transform_indices = @transform_0, window_bounds = array<i64: 1, 8, 64>}, {pipeline_mode = #tpu.pipeline_mode<synchronous>, transform_indices = @transform_1, window_bounds = array<i64: 64, 192>}, {pipeline_mode = #tpu.pipeline_mode<synchronous>, transform_indices = @transform_2, window_bounds = array<i64: 1, 192>}, {pipeline_mode = #tpu.pipeline_mode<synchronous>, transform_indices = @transform_3, window_bounds = array<i64: 64, 64>}, {pipeline_mode = #tpu.pipeline_mode<synchronous>, transform_indices = @transform_4, window_bounds = array<i64: 1, 64>}, {transform_indices = @transform_5, window_bounds = array<i64: 1, 8, 64>}]} {
    %c0 = arith.constant 0 : index
    %c0_0 = arith.constant 0 : index
    %c0_1 = arith.constant 0 : index
    %0 = vector.load %arg1[%c0, %c0_0, %c0_1] : memref<1x8x64xf32, #tpu.memory_space<vmem>>, vector<1x8x64xf32>
    %1 = vector.shape_cast %0 : vector<1x8x64xf32> to vector<8x64xf32>
    %2 = arith.truncf %1 : vector<8x64xf32> to vector<8x64xbf16>
    %c0_2 = arith.constant 0 : index
    %c0_3 = arith.constant 0 : index
    %3 = vector.load %arg2[%c0_2, %c0_3] : memref<64x192xbf16, #tpu.memory_space<vmem>>, vector<64x192xbf16>
    %cst = arith.constant dense<0.000000e+00> : vector<8x192xf32>
    %4 = tpu.matmul %2, %3, %cst {dimension_numbers = #tpu.dot_dimension_numbers<[1], [0], [0], [1], [0, 0, 1, 1], [], []>} : vector<8x64xbf16>, vector<64x192xbf16>, vector<8x192xf32> -> vector<8x192xf32>
    %c0_4 = arith.constant 0 : index
    %c0_5 = arith.constant 0 : index
    %5 = vector.load %arg3[%c0_4, %c0_5] : memref<1x192xf32, #tpu.memory_space<vmem>>, vector<1x192xf32>
    %6 = vector.broadcast %5 : vector<1x192xf32> to vector<8x192xf32>
    %7 = arith.addf %4, %6 : vector<8x192xf32>
    %8 = tpu.iota {dimensions = array<i32: 0>} : vector<8x8xi32>
    %9 = tpu.iota {dimensions = array<i32: 1>} : vector<8x8xi32>
    %10 = arith.subi %8, %9 : vector<8x8xi32>
    %11 = math.absi %10 : vector<8x8xi32>
    %c1_i32 = arith.constant 1 : i32
    %12 = vector.broadcast %c1_i32 : i32 to vector<8x8xi32>
    %13 = arith.cmpi sle, %11, %12 : vector<8x8xi32>
    %c1_i32_6 = arith.constant 1 : i32
    %14 = vector.broadcast %c1_i32_6 : i32 to vector<8x8xi32>
    %15 = arith.andi %11, %14 : vector<8x8xi32>
    %c0_i32 = arith.constant 0 : i32
    %16 = vector.broadcast %c0_i32 : i32 to vector<8x8xi32>
    %17 = arith.cmpi eq, %15, %16 : vector<8x8xi32>
    %18 = arith.ori %13, %17 : vector<8x8xi1>
    %c2_i32 = arith.constant 2 : i32
    %19 = vector.broadcast %c2_i32 : i32 to vector<8x8xi32>
    %20 = arith.cmpi sle, %11, %19 : vector<8x8xi32>
    %c3_i32 = arith.constant 3 : i32
    %21 = vector.broadcast %c3_i32 : i32 to vector<8x8xi32>
    %22 = arith.andi %11, %21 : vector<8x8xi32>
    %c0_i32_7 = arith.constant 0 : i32
    %23 = vector.broadcast %c0_i32_7 : i32 to vector<8x8xi32>
    %24 = arith.cmpi eq, %22, %23 : vector<8x8xi32>
    %25 = arith.ori %20, %24 : vector<8x8xi1>
    %c4_i32 = arith.constant 4 : i32
    %26 = vector.broadcast %c4_i32 : i32 to vector<8x8xi32>
    %27 = arith.cmpi sle, %11, %26 : vector<8x8xi32>
    %c7_i32 = arith.constant 7 : i32
    %28 = vector.broadcast %c7_i32 : i32 to vector<8x8xi32>
    %29 = arith.andi %11, %28 : vector<8x8xi32>
    %c0_i32_8 = arith.constant 0 : i32
    %30 = vector.broadcast %c0_i32_8 : i32 to vector<8x8xi32>
    %31 = arith.cmpi eq, %29, %30 : vector<8x8xi32>
    %32 = arith.ori %27, %31 : vector<8x8xi1>
    %c8_i32 = arith.constant 8 : i32
    %33 = vector.broadcast %c8_i32 : i32 to vector<8x8xi32>
    %34 = arith.cmpi sle, %11, %33 : vector<8x8xi32>
    %c15_i32 = arith.constant 15 : i32
    %35 = vector.broadcast %c15_i32 : i32 to vector<8x8xi32>
    %36 = arith.andi %11, %35 : vector<8x8xi32>
    %c0_i32_9 = arith.constant 0 : i32
    %37 = vector.broadcast %c0_i32_9 : i32 to vector<8x8xi32>
    %38 = arith.cmpi eq, %36, %37 : vector<8x8xi32>
    %39 = arith.ori %34, %38 : vector<8x8xi1>
    %c16_i32 = arith.constant 16 : i32
    %40 = vector.broadcast %c16_i32 : i32 to vector<8x8xi32>
    %41 = arith.cmpi sle, %11, %40 : vector<8x8xi32>
    %c31_i32 = arith.constant 31 : i32
    %42 = vector.broadcast %c31_i32 : i32 to vector<8x8xi32>
    %43 = arith.andi %11, %42 : vector<8x8xi32>
    %c0_i32_10 = arith.constant 0 : i32
    %44 = vector.broadcast %c0_i32_10 : i32 to vector<8x8xi32>
    %45 = arith.cmpi eq, %43, %44 : vector<8x8xi32>
    %46 = arith.ori %41, %45 : vector<8x8xi1>
    %47 = vector.extract_strided_slice %7 {offsets = [0, 0], sizes = [8, 8], strides = [1, 1]} : vector<8x192xf32> to vector<8x8xf32>
    %48 = arith.truncf %47 : vector<8x8xf32> to vector<8x8xbf16>
    %49 = vector.extract_strided_slice %7 {offsets = [0, 64], sizes = [8, 8], strides = [1, 1]} : vector<8x192xf32> to vector<8x8xf32>
    %50 = arith.truncf %49 : vector<8x8xf32> to vector<8x8xbf16>
    %51 = vector.extract_strided_slice %7 {offsets = [0, 128], sizes = [8, 8], strides = [1, 1]} : vector<8x192xf32> to vector<8x8xf32>
    %52 = arith.truncf %51 : vector<8x8xf32> to vector<8x8xbf16>
    "tpu.trace_start"() <{level = 10 : i32, message = "qd,kd->qk"}> : () -> ()
    %cst_11 = arith.constant dense<0.000000e+00> : vector<8x8xf32>
    %53 = tpu.matmul %48, %50, %cst_11 {dimension_numbers = #tpu.dot_dimension_numbers<[1], [1], [0], [0], [0, 0, 1, 0], [], []>} : vector<8x8xbf16>, vector<8x8xbf16>, vector<8x8xf32> -> vector<8x8xf32>
    %cst_12 = arith.constant -1.000000e+30 : f32
    "tpu.trace_stop"() : () -> ()
    %54 = vector.broadcast %cst_12 : f32 to vector<8x8xf32>
    %55 = arith.select %18, %53, %54 : vector<8x8xi1>, vector<8x8xf32>
    %cst_13 = arith.constant dense<0xFF800000> : vector<8xf32>
    %56 = vector.multi_reduction <maximumf>, %55, %cst_13 [1] : vector<8x8xf32> to vector<8xf32>
    %57 = vector.shape_cast %56 : vector<8xf32> to vector<8x1xf32>
    %58 = vector.broadcast %57 : vector<8x1xf32> to vector<8x8xf32>
    %59 = arith.subf %55, %58 : vector<8x8xf32>
    %60 = math.exp %59 : vector<8x8xf32>
    %cst_14 = arith.constant dense<0.000000e+00> : vector<8xf32>
    %61 = vector.multi_reduction <add>, %60, %cst_14 [1] : vector<8x8xf32> to vector<8xf32>
    %62 = vector.shape_cast %61 : vector<8xf32> to vector<8x1xf32>
    %63 = arith.truncf %60 : vector<8x8xf32> to vector<8x8xbf16>
    "tpu.trace_start"() <{level = 10 : i32, message = "qk,kd->qd"}> : () -> ()
    %cst_15 = arith.constant dense<0.000000e+00> : vector<8x8xf32>
    %64 = tpu.matmul %63, %52, %cst_15 {dimension_numbers = #tpu.dot_dimension_numbers<[1], [0], [0], [1], [0, 0, 1, 1], [], []>} : vector<8x8xbf16>, vector<8x8xbf16>, vector<8x8xf32> -> vector<8x8xf32>
    "tpu.trace_stop"() : () -> ()
    %65 = tpu.reciprocal %62 {approx = true} : vector<8x1xf32> -> vector<8x1xf32>
    %66 = vector.broadcast %65 : vector<8x1xf32> to vector<8x8xf32>
    %67 = arith.mulf %64, %66 : vector<8x8xf32>
    %68 = vector.extract_strided_slice %7 {offsets = [0, 8], sizes = [8, 8], strides = [1, 1]} : vector<8x192xf32> to vector<8x8xf32>
    %69 = arith.truncf %68 : vector<8x8xf32> to vector<8x8xbf16>
    %70 = vector.extract_strided_slice %7 {offsets = [0, 72], sizes = [8, 8], strides = [1, 1]} : vector<8x192xf32> to vector<8x8xf32>
    %71 = arith.truncf %70 : vector<8x8xf32> to vector<8x8xbf16>
    %72 = vector.extract_strided_slice %7 {offsets = [0, 136], sizes = [8, 8], strides = [1, 1]} : vector<8x192xf32> to vector<8x8xf32>
    %73 = arith.truncf %72 : vector<8x8xf32> to vector<8x8xbf16>
    "tpu.trace_start"() <{level = 10 : i32, message = "qd,kd->qk"}> : () -> ()
    %cst_16 = arith.constant dense<0.000000e+00> : vector<8x8xf32>
    %74 = tpu.matmul %69, %71, %cst_16 {dimension_numbers = #tpu.dot_dimension_numbers<[1], [1], [0], [0], [0, 0, 1, 0], [], []>} : vector<8x8xbf16>, vector<8x8xbf16>, vector<8x8xf32> -> vector<8x8xf32>
    %cst_17 = arith.constant -1.000000e+30 : f32
    "tpu.trace_stop"() : () -> ()
    %75 = vector.broadcast %cst_17 : f32 to vector<8x8xf32>
    %76 = arith.select %25, %74, %75 : vector<8x8xi1>, vector<8x8xf32>
    %cst_18 = arith.constant dense<0xFF800000> : vector<8xf32>
    %77 = vector.multi_reduction <maximumf>, %76, %cst_18 [1] : vector<8x8xf32> to vector<8xf32>
    %78 = vector.shape_cast %77 : vector<8xf32> to vector<8x1xf32>
    %79 = vector.broadcast %78 : vector<8x1xf32> to vector<8x8xf32>
    %80 = arith.subf %76, %79 : vector<8x8xf32>
    %81 = math.exp %80 : vector<8x8xf32>
    %cst_19 = arith.constant dense<0.000000e+00> : vector<8xf32>
    %82 = vector.multi_reduction <add>, %81, %cst_19 [1] : vector<8x8xf32> to vector<8xf32>
    %83 = vector.shape_cast %82 : vector<8xf32> to vector<8x1xf32>
    %84 = arith.truncf %81 : vector<8x8xf32> to vector<8x8xbf16>
    "tpu.trace_start"() <{level = 10 : i32, message = "qk,kd->qd"}> : () -> ()
    %cst_20 = arith.constant dense<0.000000e+00> : vector<8x8xf32>
    %85 = tpu.matmul %84, %73, %cst_20 {dimension_numbers = #tpu.dot_dimension_numbers<[1], [0], [0], [1], [0, 0, 1, 1], [], []>} : vector<8x8xbf16>, vector<8x8xbf16>, vector<8x8xf32> -> vector<8x8xf32>
    "tpu.trace_stop"() : () -> ()
    %86 = tpu.reciprocal %83 {approx = true} : vector<8x1xf32> -> vector<8x1xf32>
    %87 = vector.broadcast %86 : vector<8x1xf32> to vector<8x8xf32>
    %88 = arith.mulf %85, %87 : vector<8x8xf32>
    %89 = vector.extract_strided_slice %7 {offsets = [0, 16], sizes = [8, 8], strides = [1, 1]} : vector<8x192xf32> to vector<8x8xf32>
    %90 = arith.truncf %89 : vector<8x8xf32> to vector<8x8xbf16>
    %91 = vector.extract_strided_slice %7 {offsets = [0, 80], sizes = [8, 8], strides = [1, 1]} : vector<8x192xf32> to vector<8x8xf32>
    %92 = arith.truncf %91 : vector<8x8xf32> to vector<8x8xbf16>
    %93 = vector.extract_strided_slice %7 {offsets = [0, 144], sizes = [8, 8], strides = [1, 1]} : vector<8x192xf32> to vector<8x8xf32>
    %94 = arith.truncf %93 : vector<8x8xf32> to vector<8x8xbf16>
    "tpu.trace_start"() <{level = 10 : i32, message = "qd,kd->qk"}> : () -> ()
    %cst_21 = arith.constant dense<0.000000e+00> : vector<8x8xf32>
    %95 = tpu.matmul %90, %92, %cst_21 {dimension_numbers = #tpu.dot_dimension_numbers<[1], [1], [0], [0], [0, 0, 1, 0], [], []>} : vector<8x8xbf16>, vector<8x8xbf16>, vector<8x8xf32> -> vector<8x8xf32>
    %cst_22 = arith.constant -1.000000e+30 : f32
    "tpu.trace_stop"() : () -> ()
    %96 = vector.broadcast %cst_22 : f32 to vector<8x8xf32>
    %97 = arith.select %32, %95, %96 : vector<8x8xi1>, vector<8x8xf32>
    %cst_23 = arith.constant dense<0xFF800000> : vector<8xf32>
    %98 = vector.multi_reduction <maximumf>, %97, %cst_23 [1] : vector<8x8xf32> to vector<8xf32>
    %99 = vector.shape_cast %98 : vector<8xf32> to vector<8x1xf32>
    %100 = vector.broadcast %99 : vector<8x1xf32> to vector<8x8xf32>
    %101 = arith.subf %97, %100 : vector<8x8xf32>
    %102 = math.exp %101 : vector<8x8xf32>
    %cst_24 = arith.constant dense<0.000000e+00> : vector<8xf32>
    %103 = vector.multi_reduction <add>, %102, %cst_24 [1] : vector<8x8xf32> to vector<8xf32>
    %104 = vector.shape_cast %103 : vector<8xf32> to vector<8x1xf32>
    %105 = arith.truncf %102 : vector<8x8xf32> to vector<8x8xbf16>
    "tpu.trace_start"() <{level = 10 : i32, message = "qk,kd->qd"}> : () -> ()
    %cst_25 = arith.constant dense<0.000000e+00> : vector<8x8xf32>
    %106 = tpu.matmul %105, %94, %cst_25 {dimension_numbers = #tpu.dot_dimension_numbers<[1], [0], [0], [1], [0, 0, 1, 1], [], []>} : vector<8x8xbf16>, vector<8x8xbf16>, vector<8x8xf32> -> vector<8x8xf32>
    "tpu.trace_stop"() : () -> ()
    %107 = tpu.reciprocal %104 {approx = true} : vector<8x1xf32> -> vector<8x1xf32>
    %108 = vector.broadcast %107 : vector<8x1xf32> to vector<8x8xf32>
    %109 = arith.mulf %106, %108 : vector<8x8xf32>
    %110 = vector.extract_strided_slice %7 {offsets = [0, 24], sizes = [8, 8], strides = [1, 1]} : vector<8x192xf32> to vector<8x8xf32>
    %111 = arith.truncf %110 : vector<8x8xf32> to vector<8x8xbf16>
    %112 = vector.extract_strided_slice %7 {offsets = [0, 88], sizes = [8, 8], strides = [1, 1]} : vector<8x192xf32> to vector<8x8xf32>
    %113 = arith.truncf %112 : vector<8x8xf32> to vector<8x8xbf16>
    %114 = vector.extract_strided_slice %7 {offsets = [0, 152], sizes = [8, 8], strides = [1, 1]} : vector<8x192xf32> to vector<8x8xf32>
    %115 = arith.truncf %114 : vector<8x8xf32> to vector<8x8xbf16>
    "tpu.trace_start"() <{level = 10 : i32, message = "qd,kd->qk"}> : () -> ()
    %cst_26 = arith.constant dense<0.000000e+00> : vector<8x8xf32>
    %116 = tpu.matmul %111, %113, %cst_26 {dimension_numbers = #tpu.dot_dimension_numbers<[1], [1], [0], [0], [0, 0, 1, 0], [], []>} : vector<8x8xbf16>, vector<8x8xbf16>, vector<8x8xf32> -> vector<8x8xf32>
    %cst_27 = arith.constant -1.000000e+30 : f32
    "tpu.trace_stop"() : () -> ()
    %117 = vector.broadcast %cst_27 : f32 to vector<8x8xf32>
    %118 = arith.select %39, %116, %117 : vector<8x8xi1>, vector<8x8xf32>
    %cst_28 = arith.constant dense<0xFF800000> : vector<8xf32>
    %119 = vector.multi_reduction <maximumf>, %118, %cst_28 [1] : vector<8x8xf32> to vector<8xf32>
    %120 = vector.shape_cast %119 : vector<8xf32> to vector<8x1xf32>
    %121 = vector.broadcast %120 : vector<8x1xf32> to vector<8x8xf32>
    %122 = arith.subf %118, %121 : vector<8x8xf32>
    %123 = math.exp %122 : vector<8x8xf32>
    %cst_29 = arith.constant dense<0.000000e+00> : vector<8xf32>
    %124 = vector.multi_reduction <add>, %123, %cst_29 [1] : vector<8x8xf32> to vector<8xf32>
    %125 = vector.shape_cast %124 : vector<8xf32> to vector<8x1xf32>
    %126 = arith.truncf %123 : vector<8x8xf32> to vector<8x8xbf16>
    "tpu.trace_start"() <{level = 10 : i32, message = "qk,kd->qd"}> : () -> ()
    %cst_30 = arith.constant dense<0.000000e+00> : vector<8x8xf32>
    %127 = tpu.matmul %126, %115, %cst_30 {dimension_numbers = #tpu.dot_dimension_numbers<[1], [0], [0], [1], [0, 0, 1, 1], [], []>} : vector<8x8xbf16>, vector<8x8xbf16>, vector<8x8xf32> -> vector<8x8xf32>
    "tpu.trace_stop"() : () -> ()
    %128 = tpu.reciprocal %125 {approx = true} : vector<8x1xf32> -> vector<8x1xf32>
    %129 = vector.broadcast %128 : vector<8x1xf32> to vector<8x8xf32>
    %130 = arith.mulf %127, %129 : vector<8x8xf32>
    %131 = vector.extract_strided_slice %7 {offsets = [0, 32], sizes = [8, 8], strides = [1, 1]} : vector<8x192xf32> to vector<8x8xf32>
    %132 = arith.truncf %131 : vector<8x8xf32> to vector<8x8xbf16>
    %133 = vector.extract_strided_slice %7 {offsets = [0, 96], sizes = [8, 8], strides = [1, 1]} : vector<8x192xf32> to vector<8x8xf32>
    %134 = arith.truncf %133 : vector<8x8xf32> to vector<8x8xbf16>
    %135 = vector.extract_strided_slice %7 {offsets = [0, 160], sizes = [8, 8], strides = [1, 1]} : vector<8x192xf32> to vector<8x8xf32>
    %136 = arith.truncf %135 : vector<8x8xf32> to vector<8x8xbf16>
    "tpu.trace_start"() <{level = 10 : i32, message = "qd,kd->qk"}> : () -> ()
    %cst_31 = arith.constant dense<0.000000e+00> : vector<8x8xf32>
    %137 = tpu.matmul %132, %134, %cst_31 {dimension_numbers = #tpu.dot_dimension_numbers<[1], [1], [0], [0], [0, 0, 1, 0], [], []>} : vector<8x8xbf16>, vector<8x8xbf16>, vector<8x8xf32> -> vector<8x8xf32>
    %cst_32 = arith.constant -1.000000e+30 : f32
    "tpu.trace_stop"() : () -> ()
    %138 = vector.broadcast %cst_32 : f32 to vector<8x8xf32>
    %139 = arith.select %46, %137, %138 : vector<8x8xi1>, vector<8x8xf32>
    %cst_33 = arith.constant dense<0xFF800000> : vector<8xf32>
    %140 = vector.multi_reduction <maximumf>, %139, %cst_33 [1] : vector<8x8xf32> to vector<8xf32>
    %141 = vector.shape_cast %140 : vector<8xf32> to vector<8x1xf32>
    %142 = vector.broadcast %141 : vector<8x1xf32> to vector<8x8xf32>
    %143 = arith.subf %139, %142 : vector<8x8xf32>
    %144 = math.exp %143 : vector<8x8xf32>
    %cst_34 = arith.constant dense<0.000000e+00> : vector<8xf32>
    %145 = vector.multi_reduction <add>, %144, %cst_34 [1] : vector<8x8xf32> to vector<8xf32>
    %146 = vector.shape_cast %145 : vector<8xf32> to vector<8x1xf32>
    %147 = arith.truncf %144 : vector<8x8xf32> to vector<8x8xbf16>
    "tpu.trace_start"() <{level = 10 : i32, message = "qk,kd->qd"}> : () -> ()
    %cst_35 = arith.constant dense<0.000000e+00> : vector<8x8xf32>
    %148 = tpu.matmul %147, %136, %cst_35 {dimension_numbers = #tpu.dot_dimension_numbers<[1], [0], [0], [1], [0, 0, 1, 1], [], []>} : vector<8x8xbf16>, vector<8x8xbf16>, vector<8x8xf32> -> vector<8x8xf32>
    "tpu.trace_stop"() : () -> ()
    %149 = tpu.reciprocal %146 {approx = true} : vector<8x1xf32> -> vector<8x1xf32>
    %150 = vector.broadcast %149 : vector<8x1xf32> to vector<8x8xf32>
    %151 = arith.mulf %148, %150 : vector<8x8xf32>
    %152 = vector.extract_strided_slice %7 {offsets = [0, 40], sizes = [8, 8], strides = [1, 1]} : vector<8x192xf32> to vector<8x8xf32>
    %153 = arith.truncf %152 : vector<8x8xf32> to vector<8x8xbf16>
    %154 = vector.extract_strided_slice %7 {offsets = [0, 104], sizes = [8, 8], strides = [1, 1]} : vector<8x192xf32> to vector<8x8xf32>
    %155 = arith.truncf %154 : vector<8x8xf32> to vector<8x8xbf16>
    %156 = vector.extract_strided_slice %7 {offsets = [0, 168], sizes = [8, 8], strides = [1, 1]} : vector<8x192xf32> to vector<8x8xf32>
    %157 = arith.truncf %156 : vector<8x8xf32> to vector<8x8xbf16>
    "tpu.trace_start"() <{level = 10 : i32, message = "qd,kd->qk"}> : () -> ()
    %cst_36 = arith.constant dense<0.000000e+00> : vector<8x8xf32>
    %158 = tpu.matmul %153, %155, %cst_36 {dimension_numbers = #tpu.dot_dimension_numbers<[1], [1], [0], [0], [0, 0, 1, 0], [], []>} : vector<8x8xbf16>, vector<8x8xbf16>, vector<8x8xf32> -> vector<8x8xf32>
    %cst_37 = arith.constant -1.000000e+30 : f32
    "tpu.trace_stop"() : () -> ()
    %159 = vector.broadcast %cst_37 : f32 to vector<8x8xf32>
    %160 = arith.select %46, %158, %159 : vector<8x8xi1>, vector<8x8xf32>
    %cst_38 = arith.constant dense<0xFF800000> : vector<8xf32>
    %161 = vector.multi_reduction <maximumf>, %160, %cst_38 [1] : vector<8x8xf32> to vector<8xf32>
    %162 = vector.shape_cast %161 : vector<8xf32> to vector<8x1xf32>
    %163 = vector.broadcast %162 : vector<8x1xf32> to vector<8x8xf32>
    %164 = arith.subf %160, %163 : vector<8x8xf32>
    %165 = math.exp %164 : vector<8x8xf32>
    %cst_39 = arith.constant dense<0.000000e+00> : vector<8xf32>
    %166 = vector.multi_reduction <add>, %165, %cst_39 [1] : vector<8x8xf32> to vector<8xf32>
    %167 = vector.shape_cast %166 : vector<8xf32> to vector<8x1xf32>
    %168 = arith.truncf %165 : vector<8x8xf32> to vector<8x8xbf16>
    "tpu.trace_start"() <{level = 10 : i32, message = "qk,kd->qd"}> : () -> ()
    %cst_40 = arith.constant dense<0.000000e+00> : vector<8x8xf32>
    %169 = tpu.matmul %168, %157, %cst_40 {dimension_numbers = #tpu.dot_dimension_numbers<[1], [0], [0], [1], [0, 0, 1, 1], [], []>} : vector<8x8xbf16>, vector<8x8xbf16>, vector<8x8xf32> -> vector<8x8xf32>
    "tpu.trace_stop"() : () -> ()
    %170 = tpu.reciprocal %167 {approx = true} : vector<8x1xf32> -> vector<8x1xf32>
    %171 = vector.broadcast %170 : vector<8x1xf32> to vector<8x8xf32>
    %172 = arith.mulf %169, %171 : vector<8x8xf32>
    %173 = vector.extract_strided_slice %7 {offsets = [0, 48], sizes = [8, 8], strides = [1, 1]} : vector<8x192xf32> to vector<8x8xf32>
    %174 = arith.truncf %173 : vector<8x8xf32> to vector<8x8xbf16>
    %175 = vector.extract_strided_slice %7 {offsets = [0, 112], sizes = [8, 8], strides = [1, 1]} : vector<8x192xf32> to vector<8x8xf32>
    %176 = arith.truncf %175 : vector<8x8xf32> to vector<8x8xbf16>
    %177 = vector.extract_strided_slice %7 {offsets = [0, 176], sizes = [8, 8], strides = [1, 1]} : vector<8x192xf32> to vector<8x8xf32>
    %178 = arith.truncf %177 : vector<8x8xf32> to vector<8x8xbf16>
    "tpu.trace_start"() <{level = 10 : i32, message = "qd,kd->qk"}> : () -> ()
    %cst_41 = arith.constant dense<0.000000e+00> : vector<8x8xf32>
    %179 = tpu.matmul %174, %176, %cst_41 {dimension_numbers = #tpu.dot_dimension_numbers<[1], [1], [0], [0], [0, 0, 1, 0], [], []>} : vector<8x8xbf16>, vector<8x8xbf16>, vector<8x8xf32> -> vector<8x8xf32>
    %cst_42 = arith.constant -1.000000e+30 : f32
    "tpu.trace_stop"() : () -> ()
    %180 = vector.broadcast %cst_42 : f32 to vector<8x8xf32>
    %181 = arith.select %46, %179, %180 : vector<8x8xi1>, vector<8x8xf32>
    %cst_43 = arith.constant dense<0xFF800000> : vector<8xf32>
    %182 = vector.multi_reduction <maximumf>, %181, %cst_43 [1] : vector<8x8xf32> to vector<8xf32>
    %183 = vector.shape_cast %182 : vector<8xf32> to vector<8x1xf32>
    %184 = vector.broadcast %183 : vector<8x1xf32> to vector<8x8xf32>
    %185 = arith.subf %181, %184 : vector<8x8xf32>
    %186 = math.exp %185 : vector<8x8xf32>
    %cst_44 = arith.constant dense<0.000000e+00> : vector<8xf32>
    %187 = vector.multi_reduction <add>, %186, %cst_44 [1] : vector<8x8xf32> to vector<8xf32>
    %188 = vector.shape_cast %187 : vector<8xf32> to vector<8x1xf32>
    %189 = arith.truncf %186 : vector<8x8xf32> to vector<8x8xbf16>
    "tpu.trace_start"() <{level = 10 : i32, message = "qk,kd->qd"}> : () -> ()
    %cst_45 = arith.constant dense<0.000000e+00> : vector<8x8xf32>
    %190 = tpu.matmul %189, %178, %cst_45 {dimension_numbers = #tpu.dot_dimension_numbers<[1], [0], [0], [1], [0, 0, 1, 1], [], []>} : vector<8x8xbf16>, vector<8x8xbf16>, vector<8x8xf32> -> vector<8x8xf32>
    "tpu.trace_stop"() : () -> ()
    %191 = tpu.reciprocal %188 {approx = true} : vector<8x1xf32> -> vector<8x1xf32>
    %192 = vector.broadcast %191 : vector<8x1xf32> to vector<8x8xf32>
    %193 = arith.mulf %190, %192 : vector<8x8xf32>
    %194 = vector.extract_strided_slice %7 {offsets = [0, 56], sizes = [8, 8], strides = [1, 1]} : vector<8x192xf32> to vector<8x8xf32>
    %195 = arith.truncf %194 : vector<8x8xf32> to vector<8x8xbf16>
    %196 = vector.extract_strided_slice %7 {offsets = [0, 120], sizes = [8, 8], strides = [1, 1]} : vector<8x192xf32> to vector<8x8xf32>
    %197 = arith.truncf %196 : vector<8x8xf32> to vector<8x8xbf16>
    %198 = vector.extract_strided_slice %7 {offsets = [0, 184], sizes = [8, 8], strides = [1, 1]} : vector<8x192xf32> to vector<8x8xf32>
    %199 = arith.truncf %198 : vector<8x8xf32> to vector<8x8xbf16>
    "tpu.trace_start"() <{level = 10 : i32, message = "qd,kd->qk"}> : () -> ()
    %cst_46 = arith.constant dense<0.000000e+00> : vector<8x8xf32>
    %200 = tpu.matmul %195, %197, %cst_46 {dimension_numbers = #tpu.dot_dimension_numbers<[1], [1], [0], [0], [0, 0, 1, 0], [], []>} : vector<8x8xbf16>, vector<8x8xbf16>, vector<8x8xf32> -> vector<8x8xf32>
    %cst_47 = arith.constant -1.000000e+30 : f32
    "tpu.trace_stop"() : () -> ()
    %201 = vector.broadcast %cst_47 : f32 to vector<8x8xf32>
    %202 = arith.select %46, %200, %201 : vector<8x8xi1>, vector<8x8xf32>
    %cst_48 = arith.constant dense<0xFF800000> : vector<8xf32>
    %203 = vector.multi_reduction <maximumf>, %202, %cst_48 [1] : vector<8x8xf32> to vector<8xf32>
    %204 = vector.shape_cast %203 : vector<8xf32> to vector<8x1xf32>
    %205 = vector.broadcast %204 : vector<8x1xf32> to vector<8x8xf32>
    %206 = arith.subf %202, %205 : vector<8x8xf32>
    %207 = math.exp %206 : vector<8x8xf32>
    %cst_49 = arith.constant dense<0.000000e+00> : vector<8xf32>
    %208 = vector.multi_reduction <add>, %207, %cst_49 [1] : vector<8x8xf32> to vector<8xf32>
    %209 = vector.shape_cast %208 : vector<8xf32> to vector<8x1xf32>
    %210 = arith.truncf %207 : vector<8x8xf32> to vector<8x8xbf16>
    "tpu.trace_start"() <{level = 10 : i32, message = "qk,kd->qd"}> : () -> ()
    %cst_50 = arith.constant dense<0.000000e+00> : vector<8x8xf32>
    %211 = tpu.matmul %210, %199, %cst_50 {dimension_numbers = #tpu.dot_dimension_numbers<[1], [0], [0], [1], [0, 0, 1, 1], [], []>} : vector<8x8xbf16>, vector<8x8xbf16>, vector<8x8xf32> -> vector<8x8xf32>
    "tpu.trace_stop"() : () -> ()
    %212 = tpu.reciprocal %209 {approx = true} : vector<8x1xf32> -> vector<8x1xf32>
    %213 = vector.broadcast %212 : vector<8x1xf32> to vector<8x8xf32>
    %214 = arith.mulf %211, %213 : vector<8x8xf32>
    %215 = tpu.concatenate %67, %88, %109, %130, %151, %172, %193, %214 in 1 : vector<8x8xf32>, vector<8x8xf32>, vector<8x8xf32>, vector<8x8xf32>, vector<8x8xf32>, vector<8x8xf32>, vector<8x8xf32>, vector<8x8xf32> -> vector<8x64xf32>
    %216 = arith.truncf %215 : vector<8x64xf32> to vector<8x64xbf16>
    %c0_51 = arith.constant 0 : index
    %c0_52 = arith.constant 0 : index
    %217 = vector.load %arg4[%c0_51, %c0_52] : memref<64x64xbf16, #tpu.memory_space<vmem>>, vector<64x64xbf16>
    %cst_53 = arith.constant dense<0.000000e+00> : vector<8x64xf32>
    %218 = tpu.matmul %216, %217, %cst_53 {dimension_numbers = #tpu.dot_dimension_numbers<[1], [0], [0], [1], [0, 0, 1, 1], [], []>} : vector<8x64xbf16>, vector<64x64xbf16>, vector<8x64xf32> -> vector<8x64xf32>
    %c0_54 = arith.constant 0 : index
    %c0_55 = arith.constant 0 : index
    %219 = vector.load %arg5[%c0_54, %c0_55] : memref<1x64xf32, #tpu.memory_space<vmem>>, vector<1x64xf32>
    %220 = vector.broadcast %219 : vector<1x64xf32> to vector<8x64xf32>
    %221 = arith.addf %218, %220 : vector<8x64xf32>
    %c0_56 = arith.constant 0 : index
    %c0_57 = arith.constant 0 : index
    %c0_58 = arith.constant 0 : index
    %222 = vector.load %arg6[%c0_56, %c0_57, %c0_58] : memref<1x8x64xf32, #tpu.memory_space<vmem>>, vector<1x8x64xf32>
    %223 = vector.shape_cast %222 : vector<1x8x64xf32> to vector<8x64xf32>
    %224 = vector.shape_cast %221 : vector<8x64xf32> to vector<1x8x64xf32>
    tpu.vector_store %arg6[%c0_56, %c0_57, %c0_58], %224 {strides = array<i32>} : memref<1x8x64xf32, #tpu.memory_space<vmem>>, vector<1x8x64xf32>,
    return
  }
  func.func @transform_0(%arg0: i32) -> (i32, i32, i32) {
    %c0_i32 = arith.constant 0 : i32
    %c0_i32_0 = arith.constant 0 : i32
    %c0_i32_1 = arith.constant 0 : i32
    return %arg0, %c0_i32, %c0_i32_0 : i32, i32, i32
  }
  func.func @transform_1(%arg0: i32) -> (i32, i32) {
    %c0_i32 = arith.constant 0 : i32
    %c0_i32_0 = arith.constant 0 : i32
    %c0_i32_1 = arith.constant 0 : i32
    return %c0_i32, %c0_i32_0 : i32, i32
  }
  func.func @transform_2(%arg0: i32) -> (i32, i32) {
    %c0_i32 = arith.constant 0 : i32
    %c0_i32_0 = arith.constant 0 : i32
    %c0_i32_1 = arith.constant 0 : i32
    return %c0_i32, %c0_i32_0 : i32, i32
  }
  func.func @transform_3(%arg0: i32) -> (i32, i32) {
    %c0_i32 = arith.constant 0 : i32
    %c0_i32_0 = arith.constant 0 : i32
    %c0_i32_1 = arith.constant 0 : i32
    return %c0_i32, %c0_i32_0 : i32, i32
  }
  func.func @transform_4(%arg0: i32) -> (i32, i32) {
    %c0_i32 = arith.constant 0 : i32
    %c0_i32_0 = arith.constant 0 : i32
    %c0_i32_1 = arith.constant 0 : i32
    return %c0_i32, %c0_i32_0 : i32, i32
  }
  func.func @transform_5(%arg0: i32) -> (i32, i32, i32) {
    %c0_i32 = arith.constant 0 : i32
    %c0_i32_0 = arith.constant 0 : i32
    %c0_i32_1 = arith.constant 0 : i32
    return %arg0, %c0_i32, %c0_i32_0 : i32, i32, i32
  }
}

</mosaic_0001>

<bundles_post_ra>
// kernel: tpu_custom_call.1
= control target key start
LH: loop header
LB: loop body
LE: loop exit
PB: predicated region body
PF: predicated region fallthrough
CT: control target
= control target key end

     0   :  { %10 = vsyncpa [#allocation3], 0  ;;  %s1862_s0 = inlined_call_operand.hbm [shape: f32[2,8,64], index: 0, kind: input, shape index: {}]   ;;  %s1863_s1 = inlined_call_operand.hbm [shape: bf16[64,192], index: 1, kind: input, shape index: {}]   ;;  %s1864_s2 = inlined_call_operand.hbm [shape: f32[1,192], index: 2, kind: input, shape index: {}]   ;;  %s1865_s3 = inlined_call_operand.hbm [shape: bf16[64,64], index: 3, kind: input, shape index: {}]   ;;  %s1866_s4 = inlined_call_operand.vmem [shape: f32[1,64], index: 4, kind: input, shape index: {}]   ;;  %s1867_s5 = inlined_call_operand.hbm [shape: f32[2,8,64], index: 5, kind: output, shape index: {}]  }
   0x1   :  { %12 = vsyncpa [#allocation3 + $0x1], 0 }
   0x2   :  { %13 = vsyncpa [#allocation6], 0 }
   0x3   :  { %14 = vsyncpa [#allocation9], 0 }
   0x4   :  { %15 = vsyncpa [#allocation4], 0 }
   0x5   :  { %17 = vsyncpa [#allocation4 + $0x1], 0  ;;  %s1547_s18 = smov 0   ;;  %s1549_s19 = smov 0  }
   0x6   :  { %s1551_s20 = smov 0   ;;  %s1553_s21 = smov 0  }
   0x7 LB: > { %s175_s24 = sshll.u32 %s1863_s1, 4  ;;  %s1571_s25 = sadd.s32 4294967295, %s1493_s21   ;;  %s1493_s21 = sphi %s1553_s21, %s1880_s21   ;;  %s1489_s20 = sphi %s1551_s20, %s1879_s20   ;;  %s1485_s19 = sphi %s1549_s19, %s1878_s19   ;;  %s1481_s18 = sphi %s1547_s18, %s1877_s18   ;;  %s176_s24 = int_to_ptr.hbm [resolvable:$true] %s175_s24 }
   0x8   : > { %p1074_p0 = scmp.ge.s32.totalorder %s1493_s21, 1  ;;  %p44_p1 = scmp.eq.s32.totalorder %s1571_s25, 0 }
   0x9   : > { %p164_p2 = scmp.lt.s32.totalorder %s1493_s21, 3  ;;  %s1495_s27 = smov [#allocation5]  }
   0xa   : > { %s177_s28 = sshll.u32 %s1495_s27, 4  ;;  %s190_s6 = sshll.u32 %s1864_s2, 4  ;;  %s178_s28 = int_to_ptr.vmem [resolvable:$true] %s177_s28  ;;  %s191_s6 = int_to_ptr.hbm [resolvable:$true] %s190_s6 }
   0xb   : > { %p1576_p3 = pnand %p1074_p0, %p164_p2  ;;  %s201_s10 = sshll.u32 %s1865_s3, 4  ;;  %s202_s10 = int_to_ptr.hbm [resolvable:$true] %s201_s10 }
   0xc   : > { %s1496_s11 = smov [#allocation7]   ;;  %s1497_s13 = smov 128  }
   0xd   : > { %p1186_p4 = pneg %p1576_p3  ;;  %s192_s12 = sshll.u32 %s1496_s11, 4  ;;  %s193_s12 = int_to_ptr.vmem [resolvable:$true] %s192_s12 }
   0xe   : > { %s1498_s14 = smov 8   ;;  %s1499_s15 = smov [#allocation8]  }
   0xf   : > { %p1588_p6 = pnand %p1186_p4, %p44_p1  ;;  %s203_s16 = sshll.u32 %s1499_s15, 4  ;;  %s204_s16 = int_to_ptr.vmem [resolvable:$true] %s203_s16 }
  0x10   : > { %s1500_s17 = smov 64   ;;  %s1501_s22 = smov 4  }
  0x11   : > { %1189 = dma.hbm_to_vmem [thread:$0]  (!%p1588_p6), %s176_s24, 1024, %s178_s28, [#allocation6], %s1497_s13, %s1497_s13, %s1498_s14  }
  0x12   : > { %1192 = dma.hbm_to_vmem [thread:$0]  (!%p1588_p6), %s191_s6, 32, %s193_s12, [#allocation6]  }
  0x13   : > { %1195 = dma.hbm_to_vmem [thread:$0]  (!%p1588_p6), %s202_s10, 512, %s204_s16, [#allocation9], %s1500_s17, %s1500_s17, %s1501_s22  }
  0x14   : > { %s1073_s23 = sadd.s32 4294967294, %s1493_s21   ;;  %s1603_s24 = sadd.s32 1, %s1493_s21  }
  0x15   : > { %s30_s27 = sadd.s32 1, %s1489_s20  ;;  %s27_s28 = ssub.s32 %s1493_s21, %s1603_s24 }
  0x16   : > { %p37_p7 = scmp.ne.s32.totalorder %s1489_s20, %s1485_s19  ;;  %p28_p8 = scmp.eq.s32.totalorder %s27_s28, 0 }
  0x17   : > { %p38_p9 = scmp.eq.s32.totalorder %s1493_s21, 0  ;;  %p43_p10 = scmp.ne.s32.totalorder %s1485_s19, %s1481_s18 }
  0x18   : > { %p151_p11 = scmp.eq.s32.totalorder %s1571_s25, 1  ;;  %p157_p0 = scmp.eq.s32.totalorder %s1073_s23, 1 }
  0x19   : > { %s1615_s29 = scalar_select %p28_p8, %s1489_s20, %s30_s27  }
  0x1a   : > { %p1619_p12 = por %p44_p1, %p43_p10  ;;  %p1623_p13 = por %p151_p11, %p37_p7 }
  0x1b   : > { %p39_p2 = por %p38_p9, %p37_p7  ;;  %s220_s7 = sand.u32 1, %s1489_s20  }
  0x1c   : > { %p1628_p4 = por %p157_p0, %p43_p10  ;;  %p1207_p6 = scmp.lt.s32.totalorder %s1493_s21, 2 }
  0x1d   : > { %s1079_s9 = sshll.u32 %s220_s7, 3  ;;  %s1080_s10 = sshll.u32 %s1493_s21, 3 }
  0x1e   : > { %s228_s13 = scalar_lea.hbm %s1862_s0, %s1080_s10  ;;  %s224_s15 = scalar_lea.vmem [#allocation2], %s1079_s9 }
  0x1f   : > { %s230_s14 = sshll.u32 %s228_s13, 4  ;;  %s232_s16 = sshll.u32 %s224_s15, 4  ;;  %s231_s14 = int_to_ptr.hbm [resolvable:$true] %s230_s14  ;;  %s233_s16 = int_to_ptr.vmem [resolvable:$true] %s232_s16 }
  0x20   : > { %p1637_p8 = pnand %p1207_p6, %p39_p2  ;;  %s221_s22 = scalar_lea.sflag [#allocation3], %s220_s7 }
  0x21   : > { %s1389_s23 = sshra.s32 %s231_s14, 4  ;;  %s1396_s9 = scalar_lea.hbm %s1862_s0, 16  ;;  %s1390_s23 = int_to_ptr.hbm [resolvable:$true] %s1389_s23 }
  0x22   : > { %s1391_s27 = scalar_lea.hbm %s1390_s23, 8  ;;  %p1393_p9 = pneg %p1637_p8 }
  0x23   : > { %p1392_p7 = scmp.ne.s32.totalorder %s1390_s23, %s1391_s27  ;;  %p1397_p0 = scmp.lt.s32.totalorder %s1390_s23, %s1862_s0 }
  0x24   : > { %p1398_p2 = scmp.lt.s32.totalorder %s1396_s9, %s1391_s27 }
  0x25   : > { %p1394_p10 = pnand %p1393_p9, %p1392_p7 }
  0x26   : > { %p1399_p6 = por %p1398_p2, %p1397_p0 }
  0x27   : > { %p1395_p11 = pneg %p1394_p10 }
  0x29   : > { %p1400_p5 = pnand %p1399_p6, %p1395_p11 }
  0x2b   : > { %1403 = shalt.err (!%p1400_p5)
}
  0x2c   : > { %1199 = dma.hbm_to_vmem [thread:$0]  (!%p1637_p8), %s231_s14, 128, %s233_s16, %s221_s22  }
  0x2d   : > { %241 = sbr.rel (%p1576_p3) target bundleno = 1312 (0x520), region = 40  ;;  %s1654_s7 = sand.u32 (!%p1576_p3), 1, %s1485_s19  }
  0x2e   : > { %s1082_s13 = sshll.u32 (!%p1576_p3), %s1654_s7, 3  ;;  %s244_s15 = scalar_lea.sflag (!%p1576_p3), [#allocation3], %s1654_s7 }
  0x2f   : > { %s1660_s23 = scalar_lea.vmem (!%p1576_p3), [#allocation2], %s1082_s13 }
  0x32   : > { %1464 = dma.done.wait (%p1619_p12), %s244_s15, 128  }
  0x33   : > { %1466 = vsyncadd (%p1619_p12), %s244_s15, 4294967168 }
  0x34   : > { %1468 = dma.done.wait (%p44_p1), [#allocation6], 1056  }
  0x35   : > { %1470 = vsyncadd (%p44_p1), [#allocation6], 4294966240 }
  0x36   : > { %1472 = dma.done.wait (%p44_p1), [#allocation9], 512  }
  0x37   : > { %1474 = vsyncadd (%p44_p1), [#allocation9], 4294966784  ;;  %v1113_v0 = vld [vmem:[#allocation5 + $0x30] sm:$0xf]  ;;  %v1165_v1 = vld [vmem:[#allocation5 + $0x34] sm:$0xf0]  ;;  %v377_v58 = vlaneseq }
  0x38   : > { %v1105_v2 = vld [vmem:[#allocation5 + $0x20] sm:$0xf]  ;;  %v1114_v3 = vor.u32 %v1165_v1, %v1113_v0  ;;  %v1163_v4 = vld [vmem:[#allocation5 + $0x24] sm:$0xf0]  ;;  %v1164_v6 = vld [vmem:[#allocation5 + $0x34] sm:$0xf] }
  0x39   : > { %v1106_v5 = vor.u32 %v1163_v4, %v1105_v2  ;;  %v1115_v7 = vld [vmem:[#allocation5 + $0x38] sm:$0xf0]  ;;  %v1162_v8 = vld [vmem:[#allocation5 + $0x24] sm:$0xf]  ;;  %v1097_v9 = vld [vmem:[#allocation5 + $0x10] sm:$0xf] }
  0x3a   : > { %355 = vmatpush.bf16.msra.mxu0 %v1114_v3  ;;  %v1161_v10 = vld [vmem:[#allocation5 + $0x14] sm:$0xf0]  ;;  %v1118_v11 = vor.u32 %v1164_v6, %v1115_v7  ;;  %v1107_v12 = vld [vmem:[#allocation5 + $0x28] sm:$0xf0]  ;;  %v1160_v15 = vld [vmem:[#allocation5 + $0x14] sm:$0xf] }
  0x3b   : > { %v1110_v13 = vor.u32 %v1162_v8, %v1107_v12  ;;  %v1098_v14 = vor.u32 %v1161_v10, %v1097_v9  ;;  %v1099_v16 = vld [vmem:[#allocation5 + $0x18] sm:$0xf0]  ;;  %v1089_v17 = vld [vmem:[#allocation5] sm:$0xf]  ;;  %v1159_v18 = vld [vmem:[#allocation5 + $0x4] sm:$0xf0] }
  0x3c   : > { %368 = vmatpush.bf16.msra.mxu1 %v1118_v11  ;;  %v1102_v19 = vor.u32 %v1160_v15, %v1099_v16  ;;  %v1090_v20 = vor.u32 %v1159_v18, %v1089_v17  ;;  %v291_v21 = vld [vmem:[%s1660_s23] sm:$0xff]  ;;  %v1158_v22 = vld [vmem:[#allocation5 + $0x4] sm:$0xf]  ;;  %v1091_v23 = vld [vmem:[#allocation5 + $0x8] sm:$0xf0]  ;;  %vm347_vm0 = vcmask 523264  }
  0x3d   : > { %v292_v24 = vpack.c.bf16 %v291_v21, %v291_v21  ;;  %v1094_v25 = vor.u32 %v1158_v22, %v1091_v23  ;;  %v301_v26 = vld [vmem:[#allocation7] sm:$0x3]  ;;  %s1502_s26 = smov 40   ;;  %s1503_s30 = smov 56   ;;  %vm444_vm1 = vcmask 1043456   ;;  %vm410_vm2 = vcmask 64512  }
  0x3e   : > { %356 = vmatpush.bf16.msra.mxu0 %v1106_v5  ;;  %v303_v27 = vperm.slane %v301_v26, 0  ;;  %s1504_s14 = smov 64   ;;  %s1505_s16 = smov 104   ;;  %v304_v32 = vperm.slane %v301_v26, 1  ;;  %v378_v59 = vshrl.u32 %v377_v58, 7  ;;  %v380_v60 = vand.u32 127, %v377_v58 }
  0x3f   : > { %s1506_s17 = smov 120   ;;  %s1507_s22 = smov 24  }
  0x40   : > { %369 = vmatpush.bf16.msra.mxu1 %v1110_v13  ;;  %s1508_s27 = smov 48   ;;  %s1509_s28 = smov 88   ;;  %v381_v61 = vsub.s32 %v378_v59, %v380_v60 }
  0x41   : > { %s1510_s10 = smov 112   ;;  %s1511_s9 = smov 8  }
  0x42   : > { %357 = vmatpush.bf16.msra.mxu0 %v1098_v14  ;;  %s1512_s11 = smov 32   ;;  %s1513_s12 = smov 72   ;;  %v383_v62 = vsub.s32 0, %v381_v61  ;;  %vm382_vm3 = vcmp.lt.s32.totalorder %v381_v61, 0 }
  0x43   : > { %s1514_s15 = smov 96   ;;  %s1515_s23 = smov 80  }
  0x44   : > { %370 = vmatpush.bf16.msra.mxu1 %v1102_v19  ;;  %v1718_v63 = vsel %vm382_vm3, %v383_v62, %v381_v61 }
  0x45   : > { %v386_v0 = vand.u32 1, %v1718_v63  ;;  %vm385_vm4 = vcmp.le.s32.totalorder %v1718_v63, 1  ;;  %v394_v2 = vand.u32 7, %v1718_v63  ;;  %vm393_vm7 = vcmp.le.s32.totalorder %v1718_v63, 4 }
  0x46   : > { %358 = vmatpush.bf16.msra.mxu0 %v1090_v20  ;;  %vm389_vm10 = vcmp.le.s32.totalorder %v1718_v63, 2  ;;  %vm401_vm13 = vcmp.le.s32.totalorder %v1718_v63, 16  ;;  %vm397_vm3 = vcmp.le.s32.totalorder %v1718_v63, 8 }
  0x47   : > { %vm387_vm5 = vcmp.eq.s32.totalorder %v386_v0, 0  ;;  %vm395_vm8 = vcmp.eq.s32.totalorder %v394_v2, 0 }
  0x48   : > { %371 = vmatpush.bf16.msra.mxu1 %v1094_v25  ;;  %vm388_vm6 = vmor %vm385_vm4, %vm387_vm5 }
  0x49   : > { %1119 = vmatmul.msk.bf16.vlgmr.msra.gmra.mxu0 %vm347_vm0, %v292_v24  ;;  %vm396_vm9 = vmor %vm393_vm7, %vm395_vm8  ;;  %vm896_vm7 = vcmask 261120   ;;  %vm898_vm8 = vcmask 326656  }
  0x4b   : > { %1120 = vmatmul.msk.bf16.vlgmr.msra.gmra.mxu1 %vm347_vm0, %v292_v24 }
  0xc6   : > { %v360_v28 = vpop.f32.mrf.mxu0 }
  0xc7   : > { %v361_v29 = vadd.f32 %v360_v28, %v303_v27 }
  0xc8   : > { %v373_v33 = vpop.f32.mrf.mxu1 }
  0xc9   : > { %v405_v30 = vpack.c.bf16 %v361_v29, %v361_v29  ;;  %v374_v34 = vadd.f32 %v373_v33, %v304_v32 }
  0xcb   : > { %580 = vrot.lane.b32.xlu2 %v405_v30, %s1502_s26  ;;  %465 = vrot.lane.b32.xlu1 %v405_v30, %s1503_s30  ;;  %v1689_v35 = vpack.c.bf16 %v374_v34, %v374_v34 }
  0xcc   : > { %408 = vrot.lane.b32.xlu0 %v405_v30, %s1504_s14  ;;  %s1516_s14 = smov 16  }
  0xcd   : > { %v446_v36 = vsel %vm444_vm1, %v1689_v35, 0 }
  0xce   : > { %v362_v31 = vpop.f32.mrf.mxu0  ;;  %455 = vmatpush.bf16.msra.mxu3 %v446_v36 }
  0xd0   : > { %v375_v37 = vpop.f32.mrf.mxu1 }
  0xd1   : > { %v390_v37 = vand.u32 3, %v1718_v63 }
  0xd3   : > { %578 = vrot.lane.b32.xlu2 %v405_v30, %s1505_s16  ;;  %463 = vrot.lane.b32.xlu1 %v405_v30, %s1506_s17  ;;  %vm391_vm11 = vcmp.eq.s32.totalorder %v390_v37, 0 }
  0xd4   : > { %vm392_vm12 = vmor %vm389_vm10, %vm391_vm11  ;;  %vm902_vm10 = vcmask 457728  }
  0xdb   : > { %694 = vrot.lane.b32.xlu2 %v405_v30, %s1507_s22  ;;  %523 = vrot.lane.b32.xlu1 %v405_v30, %s1508_s27 }
  0xe3   : > { %692 = vrot.lane.b32.xlu2 %v405_v30, %s1509_s28  ;;  %521 = vrot.lane.b32.xlu1 %v405_v30, %s1510_s10 }
  0xeb   : > { %808 = vrot.lane.b32.xlu2 %v405_v30, %s1511_s9  ;;  %637 = vrot.lane.b32.xlu1 %v405_v30, %s1512_s11 }
  0xf3   : > { %806 = vrot.lane.b32.xlu2 %v405_v30, %s1513_s12  ;;  %635 = vrot.lane.b32.xlu1 %v405_v30, %s1514_s15 }
  0xfb   : > { %749 = vrot.lane.b32.xlu2 %v405_v30, %s1515_s23  ;;  %751 = vrot.lane.b32.xlu1 %v405_v30, %s1516_s14 }
 0x103   : > { %498 = vrot.lane.b32.xlu1 %v1689_v35, %s1506_s17 }
 0x10b   : > { %612 = vrot.lane.b32.xlu1 %v1689_v35, %s1505_s16 }
 0x113   : > { %669 = vrot.lane.b32.xlu1 %v1689_v35, %s1514_s15 }
 0x125   : > { %v1697_v38 = vpop.permute.xlu2 %580 }
 0x126   : > { %v586_v20 = vsel %vm410_vm2, %v1697_v38, 0 }
 0x12d   : > { %v1701_v43 = vpop.permute.xlu2 %578 }
 0x135   : > { %v1706_v45 = vpop.permute.xlu2 %694 }
 0x136   : > { %v700_v26 = vsel %vm410_vm2, %v1706_v45, 0 }
 0x13d   : > { %v466_v39 = vpop.permute.xlu1 %465  ;;  %v1710_v49 = vpop.permute.xlu2 %692 }
 0x13e   : > { %v409_v40 = vpop.permute.xlu0 %408  ;;  %v471_v41 = vsel %vm410_vm2, %v466_v39, 0  ;;  %v402_v39 = vand.u32 31, %v1718_v63 }
 0x13f   : > { %v415_v42 = vsel %vm410_vm2, %v409_v40, 0  ;;  %480 = vmatpush.bf16.xpose.msrb.mxu3 %v471_v41 }
 0x140   : > { %424 = vmatpush.bf16.xpose.msra.mxu2 %v415_v42  ;;  %vm403_vm14 = vcmp.eq.s32.totalorder %v402_v39, 0 }
 0x141   : > { %vm1764_vm15 = vmor %vm401_vm13, %vm403_vm14 }
 0x145   : > { %v1703_v44 = vpop.permute.xlu1 %463  ;;  %v809_v52 = vpop.permute.xlu2 %808 }
 0x146   : > { %v814_v28 = vsel %vm410_vm2, %v809_v52, 0 }
 0x147   : > { %1121 = vmatmul.msk.bf16.vlgmr.msra.gmra.mxu2 %vm410_vm2, %v405_v30 }
 0x14d   : > { %v524_v46 = vpop.permute.xlu1 %523  ;;  %v1714_v54 = vpop.permute.xlu2 %806 }
 0x14e   : > { %v529_v47 = vsel %vm410_vm2, %v524_v46, 0 }
 0x14f   : > { %538 = vmatpush.bf16.xpose.msrb.mxu0 %v529_v47  ;;  %v398_v47 = vand.u32 15, %v1718_v63 }
 0x151   : > { %vm399_vm4 = vcmp.eq.s32.totalorder %v398_v47, 0 }
 0x152   : > { %vm400_vm5 = vmor %vm397_vm3, %vm399_vm4 }
 0x155   : > { %v522_v48 = vpop.permute.xlu1 %521  ;;  %v750_v57 = vpop.permute.xlu2 %749 }
 0x156   : > { %1125 = vmatmul.msk.bf16.vlgmr.msrb.gmra.mxu0 %vm410_vm2, %v522_v48 }
 0x15d   : > { %v638_v50 = vpop.permute.xlu1 %637 }
 0x15e   : > { %v643_v51 = vsel %vm410_vm2, %v638_v50, 0 }
 0x15f   : > { %652 = vmatpush.bf16.xpose.msra.mxu0 %v643_v51 }
 0x165   : > { %v636_v53 = vpop.permute.xlu1 %635 }
 0x166   : > { %1129 = vmatmul.msk.bf16.vlgmr.msra.gmra.mxu0 %vm410_vm2, %v636_v53 }
 0x16d   : > { %v752_v55 = vpop.permute.xlu1 %751 }
 0x16e   : > { %v757_v56 = vsel %vm410_vm2, %v752_v55, 0 }
 0x16f   : > { %766 = vmatpush.bf16.xpose.msrb.mxu0 %v757_v56 }
 0x175   : > { %v499_v29 = vpop.permute.xlu1 %498 }
 0x176   : > { %1133 = vmatmul.msk.bf16.vlgmr.msrb.gmra.mxu0 %vm410_vm2, %v750_v57  ;;  %v504_v30 = vsel %vm444_vm1, %v499_v29, 0 }
 0x177   : > { %513 = vmatpush.bf16.msrb.mxu2 %v504_v30 }
 0x17d   : > { %v613_v31 = vpop.permute.xlu1 %612 }
 0x17e   : > { %v618_v32 = vsel %vm444_vm1, %v613_v31, 0 }
 0x17f   : > { %627 = vmatpush.bf16.msra.mxu2 %v618_v32 }
 0x185   : > { %v670_v33 = vpop.permute.xlu1 %669 }
 0x186   : > { %v675_v34 = vsel %vm444_vm1, %v670_v33, 0 }
 0x1ca   : > { %v426_v1 = vpop.f32.mrf.mxu2 }
 0x1cb   : > { %v430_v3 = vsel %vm388_vm6, %v426_v1, -1e+30  ;;  %vm894_vm6 = vcmask 195584  }
 0x1cc   : > { %v431_v4 = vsel %vm410_vm2, %v430_v3, -inf }
 0x1cd   : > { %432 = vmax.xlane.f32.xlu0 %v431_v4 }
 0x1d2   : > { %v428_v5 = vpop.f32.mrf.mxu2 }
 0x1d3   : > { %v540_v6 = vpop.f32.mrf.mxu0 }
 0x1d4   : > { %v544_v7 = vsel %vm396_vm9, %v540_v6, -1e+30  ;;  %vm900_vm9 = vcmask 392192  }
 0x1d5   : > { %v545_v8 = vsel %vm410_vm2, %v544_v7, -inf }
 0x1d6   : > { %546 = vmax.xlane.f32.xlu0 %v545_v8 }
 0x1db   : > { %v542_v9 = vpop.f32.mrf.mxu0 }
 0x1e3   : > { %v654_v10 = vpop.f32.mrf.mxu0 }
 0x1e4   : > { %v658_v46 = vsel %vm1764_vm15, %v654_v10, -1e+30 }
 0x1ea   : > { %555 = vrot.lane.b32.xlu0 %v1689_v35, %s1510_s10 }
 0x1eb   : > { %v656_v11 = vpop.f32.mrf.mxu0 }
 0x1f3   : > { %v768_v12 = vpop.f32.mrf.mxu0 }
 0x1f4   : > { %v772_v50 = vsel %vm1764_vm15, %v768_v12, -1e+30 }
 0x1f5   : > { %v773_v53 = vsel %vm410_vm2, %v772_v50, -inf }
 0x1fb   : > { %v770_v13 = vpop.f32.mrf.mxu0 }
 0x240   : > { %v433_v14 = vpop.xlane.xlu0 %432 }
 0x241   : > { %v434_v15 = vsub.f32 %v430_v3, %v433_v14 }
 0x243   : > { %v435_v16 = vmul.f32 1.442695, %v434_v15 }
 0x245   : > { %1267 = vpow2.f32 %v435_v16 }
 0x249   : > { %v547_v18 = vpop.xlane.xlu0 %546 }
 0x24a   : > { %v548_v21 = vsub.f32 %v544_v7, %v547_v18 }
 0x24b   : > { %v1728_v17 = vpop.eup %1267 }
 0x24c   : > { %v440_v19 = vpack.c.bf16 %v1728_v17, %v1728_v17  ;;  %v549_v22 = vmul.f32 1.442695, %v548_v21 }
 0x24e   : > { %1122 = vmatmul.msk.bf16.vlgmr.msra.gmra.mxu3 %vm410_vm2, %v440_v19  ;;  %1269 = vpow2.f32 %v549_v22 }
 0x24f   : > { %595 = vmatpush.bf16.xpose.msra.mxu3 %v586_v20 }
 0x254   : > { %v1735_v23 = vpop.eup %1269 }
 0x255   : > { %v554_v27 = vpack.c.bf16 %v1735_v23, %v1735_v23  ;;  %v551_v63 = vsel %vm410_vm2, %v1735_v23, 0.0 }
 0x25c   : > { %v556_v24 = vpop.permute.xlu0 %555 }
 0x25d   : > { %v561_v25 = vsel %vm444_vm1, %v556_v24, 0 }
 0x25e   : > { %1123 = vmatmul.msk.bf16.vlgmr.msrb.gmra.mxu3 %vm410_vm2, %v1703_v44  ;;  %570 = vmatpush.bf16.msrb.mxu1 %v561_v25 }
 0x25f   : > { %709 = vmatpush.bf16.xpose.msrb.mxu3 %v700_v26 }
 0x261   : > { %1126 = vmatmul.msk.bf16.vlgmr.msrb.gmra.mxu1 %vm410_vm2, %v554_v27 }
 0x262   : > { %684 = vmatpush.bf16.msra.mxu1 %v675_v34  ;;  %v437_v34 = vsel %vm410_vm2, %v1728_v17, 0.0 }
 0x26e   : > { %1127 = vmatmul.msk.bf16.vlgmr.msra.gmra.mxu3 %vm410_vm2, %v1701_v43 }
 0x26f   : > { %823 = vmatpush.bf16.xpose.msra.mxu3 %v814_v28 }
 0x27e   : > { %1131 = vmatmul.msk.bf16.vlgmr.msrb.gmra.mxu3 %vm410_vm2, %v1710_v49  ;;  %v659_v49 = vsel %vm410_vm2, %v658_v46, -inf }
 0x28e   : > { %1135 = vmatmul.msk.bf16.vlgmr.msra.gmra.mxu3 %vm410_vm2, %v1714_v54 }
 0x2d1   : > { %v1755_v36 = vpop.f32.mrf.mxu3 }
 0x2d9   : > { %v459_v38 = vpop.f32.mrf.mxu3 }
 0x2de   : > { %v1760_v40 = vpop.f32.mrf.mxu1 }
 0x2e1   : > { %v482_v41 = vpop.f32.mrf.mxu3 }
 0x2e2   : > { %v486_v42 = vsel %vm392_vm12, %v482_v41, -1e+30 }
 0x2e3   : > { %v487_v43 = vsel %vm410_vm2, %v486_v42, -inf }
 0x2e4   : > { %488 = vmax.xlane.f32.xlu0 %v487_v43 }
 0x2e6   : > { %v574_v45 = vpop.f32.mrf.mxu1 }
 0x2e9   : > { %v484_v48 = vpop.f32.mrf.mxu3 }
 0x2ec   : > { %660 = vmax.xlane.f32.xlu0 %v659_v49 }
 0x2f1   : > { %v597_v51 = vpop.f32.mrf.mxu3 }
 0x2f2   : > { %v601_v52 = vsel %vm400_vm5, %v597_v51, -1e+30 }
 0x2f3   : > { %v602_v54 = vsel %vm410_vm2, %v601_v52, -inf }
 0x2f4   : > { %774 = vmax.xlane.f32.xlu0 %v773_v53  ;;  %603 = vmax.xlane.f32.xlu2 %v602_v54 }
 0x2f9   : > { %v599_v55 = vpop.f32.mrf.mxu3 }
 0x301   : > { %v711_v56 = vpop.f32.mrf.mxu3 }
 0x302   : > { %v715_v57 = vsel %vm1764_vm15, %v711_v56, -1e+30 }
 0x303   : > { %v716_v58 = vsel %vm410_vm2, %v715_v57, -inf }
 0x304   : > { %717 = vmax.xlane.f32.xlu1 %v716_v58 }
 0x308   : > { %840 = vrot.lane.b32.xlu0 %v1689_v35, %s1513_s12 }
 0x309   : > { %v713_v59 = vpop.f32.mrf.mxu3 }
 0x30c   : > { %726 = vrot.lane.b32.xlu2 %v1689_v35, %s1509_s28  ;;  %s289_s28 = scalar_lea.vmem [#allocation10], %s1082_s13  ;;  %s1439_s13 = scalar_lea.hbm %s1867_s5, 16 }
 0x30d   : > { %s971_s10 = sshll.u32 %s289_s28, 4  ;;  %s972_s10 = int_to_ptr.vmem [resolvable:$true] %s971_s10 }
 0x311   : > { %v825_v60 = vpop.f32.mrf.mxu3 }
 0x312   : > { %v1788_v62 = vsel %vm1764_vm15, %v825_v60, -1e+30 }
 0x313   : > { %v830_v0 = vsel %vm410_vm2, %v1788_v62, -inf }
 0x319   : > { %v827_v61 = vpop.f32.mrf.mxu3 }
 0x31d   : > { %783 = vrot.lane.b32.xlu1 %v1689_v35, %s1515_s23 }
 0x332   : > { %552 = vadd.xlane.f32.xlu0 %v551_v63 }
 0x335   : > { %831 = vmax.xlane.f32.xlu2 %v830_v0 }
 0x357   : > { %v489_v1 = vpop.xlane.xlu0 %488 }
 0x358   : > { %v490_v2 = vsub.f32 %v486_v42, %v489_v1 }
 0x35a   : > { %v491_v3 = vmul.f32 1.442695, %v490_v2 }
 0x35c   : > { %1271 = vpow2.f32 %v491_v3 }
 0x35f   : > { %v661_v4 = vpop.xlane.xlu0 %660 }
 0x360   : > { %v662_v5 = vsub.f32 %v658_v46, %v661_v4 }
 0x362   : > { %v1272_v6 = vpop.eup %1271  ;;  %v663_v35 = vmul.f32 1.442695, %v662_v5 }
 0x363   : > { %v493_v7 = vsel %vm410_vm2, %v1272_v6, 0.0  ;;  %v496_v8 = vpack.c.bf16 %v1272_v6, %v1272_v6 }
 0x364   : > { %1273 = vpow2.f32 %v663_v35  ;;  %494 = vadd.xlane.f32.xlu1 %v493_v7 }
 0x365   : > { %1124 = vmatmul.msk.bf16.vlgmr.msrb.gmra.mxu2 %vm410_vm2, %v496_v8 }
 0x367   : > { %v604_v9 = vpop.xlane.xlu2 %603  ;;  %v775_v10 = vpop.xlane.xlu0 %774 }
 0x368   : > { %v605_v11 = vsub.f32 %v601_v52, %v604_v9  ;;  %v776_v12 = vsub.f32 %v772_v50, %v775_v10 }
 0x36a   : > { %v1274_v13 = vpop.eup %1273  ;;  %v606_v14 = vmul.f32 1.442695, %v605_v11  ;;  %v777_v15 = vmul.f32 1.442695, %v776_v12 }
 0x36b   : > { %v668_v16 = vpack.c.bf16 %v1274_v13, %v1274_v13  ;;  %v665_v18 = vsel %vm410_vm2, %v1274_v13, 0.0  ;;  %v1169_v13 = vld [vmem:[#allocation8 + $0x18] sm:$0xff] }
 0x36c   : > { %1275 = vpow2.f32 %v606_v14  ;;  %666 = vadd.xlane.f32.xlu2 %v665_v18  ;;  %948 = vmatpush.bf16.msra.mxu0 %v1169_v13  ;;  %v1168_v14 = vld [vmem:[#allocation8 + $0x10] sm:$0xff] }
 0x36d   : > { %1277 = vpow2.f32 %v777_v15  ;;  %1130 = vmatmul.msk.bf16.vlgmr.msra.gmra.mxu1 %vm410_vm2, %v668_v16  ;;  %v1167_v15 = vld [vmem:[#allocation8 + $0x8] sm:$0xff]  ;;  %v1166_v16 = vld [vmem:[#allocation8] sm:$0xff] }
 0x36f   : > { %v727_v19 = vpop.permute.xlu2 %726 }
 0x370   : > { %v732_v20 = vsel %vm444_vm1, %v727_v19, 0  ;;  %949 = vmatpush.bf16.msra.mxu0 %v1168_v14 }
 0x371   : > { %741 = vmatpush.bf16.msrb.mxu2 %v732_v20 }
 0x372   : > { %v1276_v21 = vpop.eup %1275 }
 0x373   : > { %v1278_v22 = vpop.eup %1277  ;;  %v611_v23 = vpack.c.bf16 %v1276_v21, %v1276_v21  ;;  %v608_v30 = vsel %vm410_vm2, %v1276_v21, 0.0 }
 0x374   : > { %v779_v24 = vsel %vm410_vm2, %v1278_v22, 0.0  ;;  %v782_v39 = vpack.c.bf16 %v1278_v22, %v1278_v22  ;;  %950 = vmatpush.bf16.msra.mxu0 %v1167_v15 }
 0x375   : > { %780 = vadd.xlane.f32.xlu2 %v779_v24  ;;  %1128 = vmatmul.msk.bf16.vlgmr.msra.gmra.mxu2 %vm410_vm2, %v611_v23 }
 0x377   : > { %v718_v25 = vpop.xlane.xlu1 %717 }
 0x378   : > { %v719_v26 = vsub.f32 %v715_v57, %v718_v25  ;;  %951 = vmatpush.bf16.msra.mxu0 %v1166_v16 }
 0x37a   : > { %v720_v27 = vmul.f32 1.442695, %v719_v26  ;;  %v841_v28 = vpop.permute.xlu0 %840 }
 0x37b   : > { %v846_v29 = vsel %vm444_vm1, %v841_v28, 0 }
 0x37c   : > { %1279 = vpow2.f32 %v720_v27  ;;  %855 = vmatpush.bf16.msra.mxu2 %v846_v29 }
 0x37d   : > { %609 = vadd.xlane.f32.xlu2 %v608_v30 }
 0x382   : > { %v1280_v31 = vpop.eup %1279 }
 0x383   : > { %v725_v32 = vpack.c.bf16 %v1280_v31, %v1280_v31  ;;  %v722_v33 = vsel %vm410_vm2, %v1280_v31, 0.0 }
 0x385   : > { %723 = vadd.xlane.f32.xlu2 %v722_v33  ;;  %1132 = vmatmul.msk.bf16.vlgmr.msrb.gmra.mxu2 %vm410_vm2, %v725_v32 }
 0x38d   : > { %438 = vadd.xlane.f32.xlu2 %v437_v34 }
 0x38f   : > { %v784_v37 = vpop.permute.xlu1 %783 }
 0x390   : > { %v789_v38 = vsel %vm444_vm1, %v784_v37, 0  ;;  %vm892_vm1 = vcmask 130048   ;;  %v1266_v37 = vld [vmem:[%s1866_s4] ss:$0 sm:$0xff] }
 0x391   : > { %798 = vmatpush.bf16.msrb.mxu1 %v789_v38 }
 0x394   : > { %1134 = vmatmul.msk.bf16.vlgmr.msrb.gmra.mxu1 %vm410_vm2, %v782_v39 }
 0x3a5   : > { %v553_v41 = vpop.xlane.xlu0 %552 }
 0x3a6   : > { %1281 = vrcp.f32 %v553_v41 }
 0x3a8   : > { %v832_v42 = vpop.xlane.xlu2 %831 }
 0x3a9   : > { %v833_v43 = vsub.f32 %v1788_v62, %v832_v42 }
 0x3ab   : > { %v834_v44 = vmul.f32 1.442695, %v833_v43 }
 0x3ac   : > { %v1282_v45 = vpop.eup %1281 }
 0x3ad   : > { %1283 = vpow2.f32 %v834_v44  ;;  %v577_v46 = vmul.f32 %v1282_v45, %v1760_v40 }
 0x3af   : > { %868 = vrot.lane.b32.xlu0 %v577_v46, %s1516_s14 }
 0x3b3   : > { %v1284_v17 = vpop.eup %1283 }
 0x3b4   : > { %v839_v47 = vpack.c.bf16 %v1284_v17, %v1284_v17  ;;  %v836_v48 = vsel %vm410_vm2, %v1284_v17, 0.0 }
 0x3b5   : > { %837 = vadd.xlane.f32.xlu1 %v836_v48 }
 0x3b6   : > { %1136 = vmatmul.msk.bf16.vlgmr.msra.gmra.mxu2 %vm410_vm2, %v839_v47 }
 0x3d7   : > { %v495_v49 = vpop.xlane.xlu1 %494 }
 0x3d8   : > { %1285 = vrcp.f32 %v495_v49 }
 0x3de   : > { %v1286_v51 = vpop.eup %1285 }
 0x3df   : > { %v667_v50 = vpop.xlane.xlu2 %666 }
 0x3e0   : > { %1287 = vrcp.f32 %v667_v50 }
 0x3e6   : > { %v1288_v55 = vpop.eup %1287 }
 0x3e8   : > { %v781_v52 = vpop.xlane.xlu2 %780  ;;  %v515_v53 = vpop.f32.mrf.mxu2 }
 0x3e9   : > { %v520_v54 = vmul.f32 %v1286_v51, %v515_v53 }
 0x3ea   : > { %v686_v56 = vpop.f32.mrf.mxu1 }
 0x3eb   : > { %v691_v40 = vmul.f32 %v1288_v55, %v686_v56  ;;  %864 = vrot.lane.b32.xlu1 %v520_v54, %s1511_s9 }
 0x3ed   : > { %876 = vrot.lane.b32.xlu0 %v691_v40, %s1512_s11 }
 0x3f0   : > { %v610_v57 = vpop.xlane.xlu2 %609  ;;  %v517_v58 = vpop.f32.mrf.mxu2 }
 0x3f1   : > { %1289 = vrcp.f32 %v610_v57 }
 0x3f2   : > { %v688_v59 = vpop.f32.mrf.mxu1 }
 0x3f7   : > { %v1290_v60 = vpop.eup %1289 }
 0x3f8   : > { %v629_v61 = vpop.f32.mrf.mxu2  ;;  %v724_v63 = vpop.xlane.xlu2 %723 }
 0x3f9   : > { %v634_v62 = vmul.f32 %v1290_v60, %v629_v61  ;;  %1291 = vrcp.f32 %v724_v63 }
 0x3fa   : > { %1293 = vrcp.f32 %v781_v52 }
 0x3fb   : > { %872 = vrot.lane.b32.xlu2 %v634_v62, %s1507_s22 }
 0x3ff   : > { %v1292_v1 = vpop.eup %1291 }
 0x400   : > { %v631_v0 = vpop.f32.mrf.mxu2  ;;  %v1294_v5 = vpop.eup %1293 }
 0x401   : > { %v439_v18 = vpop.xlane.xlu2 %438 }
 0x408   : > { %v743_v2 = vpop.f32.mrf.mxu2 }
 0x409   : > { %v748_v3 = vmul.f32 %v1292_v1, %v743_v2 }
 0x40b   : > { %880 = vrot.lane.b32.xlu1 %v748_v3, %s1502_s26  ;;  %s1155_s26 = sshll.u32 %s1571_s25, 3  ;;  %s959_s25 = scalar_lea.sflag [#allocation4], %s1654_s7 }
 0x40c   : > { %s969_s17 = scalar_lea.hbm %s1867_s5, %s1155_s26 }
 0x40d   : > { %s973_s9 = sshll.u32 %s969_s17, 4  ;;  %s974_s9 = int_to_ptr.hbm [resolvable:$true] %s973_s9 }
 0x40e   : > { %s1433_s11 = sshra.s32 %s974_s9, 4  ;;  %s1434_s11 = int_to_ptr.hbm [resolvable:$true] %s1433_s11 }
 0x40f   : > { %s1435_s12 = scalar_lea.hbm %s1434_s11, 8  ;;  %p1440_p12 = scmp.lt.s32.totalorder %s1434_s11, %s1867_s5 }
 0x410   : > { %v745_v4 = vpop.f32.mrf.mxu2  ;;  %p1436_p1 = scmp.ne.s32.totalorder %s1434_s11, %s1435_s12  ;;  %p1441_p8 = scmp.lt.s32.totalorder %s1439_s13, %s1435_s12 }
 0x411   : > { %v800_v6 = vpop.f32.mrf.mxu1 }
 0x412   : > { %v805_v35 = vmul.f32 %v1294_v5, %v800_v6  ;;  %p1437_p3 = pnand %p1436_p1, %p1623_p13  ;;  %p1442_p7 = por %p1441_p8, %p1440_p12 }
 0x414   : > { %884 = vrot.lane.b32.xlu0 %v805_v35, %s1508_s27  ;;  %p1438_p5 = pneg %p1437_p3 }
 0x416   : > { %p1443_p9 = pnand %p1442_p7, %p1438_p5 }
 0x419   : > { %v802_v7 = vpop.f32.mrf.mxu1 }
 0x421   : > { %v869_v19 = vpop.permute.xlu0 %868 }
 0x428   : > { %v838_v8 = vpop.xlane.xlu1 %837 }
 0x429   : > { %1295 = vrcp.f32 %v838_v8 }
 0x42a   : > { %1297 = vrcp.f32 %v439_v18 }
 0x42f   : > { %v1296_v9 = vpop.eup %1295 }
 0x430   : > { %v1298_v20 = vpop.eup %1297 }
 0x431   : > { %v462_v22 = vmul.f32 %v1298_v20, %v1755_v36 }
 0x439   : > { %v857_v10 = vpop.f32.mrf.mxu2 }
 0x43a   : > { %v862_v11 = vmul.f32 %v1296_v9, %v857_v10 }
 0x43c   : > { %888 = vrot.lane.b32.xlu2 %v862_v11, %s1503_s30 }
 0x441   : > { %v859_v12 = vpop.f32.mrf.mxu2 }
 0x455   : > { %v873_v25 = vpop.permute.xlu2 %872 }
 0x45d   : > { %v865_v21 = vpop.permute.xlu1 %864 }
 0x45e   : > { %v891_v23 = vsel %vm410_vm2, %v462_v22, %v865_v21 }
 0x45f   : > { %v877_v24 = vpop.permute.xlu0 %876  ;;  %v893_v26 = vsel %vm892_vm1, %v891_v23, %v869_v19 }
 0x460   : > { %v895_v27 = vsel %vm894_vm6, %v893_v26, %v873_v25 }
 0x461   : > { %v897_v30 = vsel %vm896_vm7, %v895_v27, %v877_v24 }
 0x47d   : > { %v881_v28 = vpop.permute.xlu1 %880 }
 0x47e   : > { %v899_v31 = vsel %vm898_vm8, %v897_v30, %v881_v28 }
 0x486   : > { %v885_v29 = vpop.permute.xlu0 %884 }
 0x487   : > { %v901_v32 = vsel %vm900_vm9, %v899_v31, %v885_v29 }
 0x496   : > { %v889_v36 = vpop.permute.xlu2 %888 }
 0x497   : > { %v903_v33 = vsel %vm902_vm10, %v901_v32, %v889_v36 }
 0x498   : > { %v904_v34 = vpack.c.bf16 %v903_v33, %v903_v33 }
 0x49a   : > { %1153 = vmatmul.msk.bf16.vlgmr.msra.gmra.mxu0 %vm347_vm0, %v904_v34 }
 0x517   : > { %v953_v38 = vpop.f32.mrf.mxu0 }
 0x518   : > { %v954_v39 = vadd.f32 %v1266_v37, %v953_v38 }
 0x51a   : > { %957 = vst.msk [vmem:[%s289_s28] sm:$0xff] %vm347_vm0, %v954_v39 }
 0x51b   : > { %1446 = shalt.err (!%p1443_p9)
}
 0x51c   : > { %1184 = dma.vmem_to_hbm [thread:$0]  (%p1623_p13), %s972_s10, 128, %s974_s9, %s959_s25  }
 0x51f   : > { %v955_v41 = vpop.f32.mrf.mxu0 }
 0x520 PF: > { %s985_s7 = sand.u32 1, %s1481_s18   ;;  %p1876_p10 = scmp.ge.s32.totalorder %s1493_s21, 2 }
 0x521   : > { %s986_s30 = scalar_lea.sflag [#allocation4], %s985_s7 }
 0x522   : > { %p1201_p11 = pnand %p1876_p10, %p1628_p4 }
 0x524   : > { %p1202_p0 = pneg %p1201_p11 }
 0x526   : > { %1476 = dma.done.wait (%p1202_p0), %s986_s30, 128  }
 0x527   : > { %1478 = vsyncadd (%p1202_p0), %s986_s30, 4294967168  ;;  %p20_p2 = scmp.ge.s32.totalorder %s1603_s24, 4   ;;  %s1877_s18 = smov %s1485_s19 }
 0x528   : > { %s1878_s19 = smov %s1489_s20  ;;  %s1879_s20 = smov %s1615_s29 }
 0x529   : > { %s1880_s21 = smov %s1603_s24  ;;  %22 = sbr.rel (!%p20_p2) target bundleno = 7 (0x7), region = 97 }
 0x52e   :  { %992 = vsyncpa [#allocation3], 1 }
 0x52f   :  { %994 = vsyncpa [#allocation3 + $0x1], 1 }
 0x530   :  { %995 = vsyncpa [#allocation6], 1 }
 0x531   :  { %996 = vsyncpa [#allocation9], 1 }
 0x532   :  { %997 = vsyncpa [#allocation4], 1 }
 0x533   :  { %999 = vsyncpa [#allocation4 + $0x1], 1 }

// kernel: tpu_custom_call.1
= control target key start
LH: loop header
LB: loop body
LE: loop exit
PB: predicated region body
PF: predicated region fallthrough
CT: control target
= control target key end

     0   :  { %10 = vsyncpa [#allocation3], 0  ;;  %s1862_s0 = inlined_call_operand.hbm [shape: f32[2,8,64], index: 0, kind: input, shape index: {}]   ;;  %s1863_s1 = inlined_call_operand.hbm [shape: bf16[64,192], index: 1, kind: input, shape index: {}]   ;;  %s1864_s2 = inlined_call_operand.hbm [shape: f32[1,192], index: 2, kind: input, shape index: {}]   ;;  %s1865_s3 = inlined_call_operand.hbm [shape: bf16[64,64], index: 3, kind: input, shape index: {}]   ;;  %s1866_s4 = inlined_call_operand.vmem [shape: f32[1,64], index: 4, kind: input, shape index: {}]   ;;  %s1867_s5 = inlined_call_operand.hbm [shape: f32[2,8,64], index: 5, kind: output, shape index: {}]  }
   0x1   :  { %12 = vsyncpa [#allocation3 + $0x1], 0 }
   0x2   :  { %13 = vsyncpa [#allocation6], 0 }
   0x3   :  { %14 = vsyncpa [#allocation9], 0 }
   0x4   :  { %15 = vsyncpa [#allocation4], 0 }
   0x5   :  { %17 = vsyncpa [#allocation4 + $0x1], 0  ;;  %s1547_s18 = smov 0   ;;  %s1549_s19 = smov 0  }
   0x6   :  { %s1551_s20 = smov 0   ;;  %s1553_s21 = smov 0  }
   0x7 LB: > { %s175_s24 = sshll.u32 %s1863_s1, 4  ;;  %s1571_s25 = sadd.s32 4294967295, %s1493_s21   ;;  %s1493_s21 = sphi %s1553_s21, %s1880_s21   ;;  %s1489_s20 = sphi %s1551_s20, %s1879_s20   ;;  %s1485_s19 = sphi %s1549_s19, %s1878_s19   ;;  %s1481_s18 = sphi %s1547_s18, %s1877_s18   ;;  %s176_s24 = int_to_ptr.hbm [resolvable:$true] %s175_s24 }
   0x8   : > { %p1074_p0 = scmp.ge.s32.totalorder %s1493_s21, 1  ;;  %p44_p1 = scmp.eq.s32.totalorder %s1571_s25, 0 }
   0x9   : > { %p164_p2 = scmp.lt.s32.totalorder %s1493_s21, 3  ;;  %s1495_s27 = smov [#allocation5]  }
   0xa   : > { %s177_s28 = sshll.u32 %s1495_s27, 4  ;;  %s190_s6 = sshll.u32 %s1864_s2, 4  ;;  %s178_s28 = int_to_ptr.vmem [resolvable:$true] %s177_s28  ;;  %s191_s6 = int_to_ptr.hbm [resolvable:$true] %s190_s6 }
   0xb   : > { %p1576_p3 = pnand %p1074_p0, %p164_p2  ;;  %s201_s10 = sshll.u32 %s1865_s3, 4  ;;  %s202_s10 = int_to_ptr.hbm [resolvable:$true] %s201_s10 }
   0xc   : > { %s1496_s11 = smov [#allocation7]   ;;  %s1497_s13 = smov 128  }
   0xd   : > { %p1186_p4 = pneg %p1576_p3  ;;  %s192_s12 = sshll.u32 %s1496_s11, 4  ;;  %s193_s12 = int_to_ptr.vmem [resolvable:$true] %s192_s12 }
   0xe   : > { %s1498_s14 = smov 8   ;;  %s1499_s15 = smov [#allocation8]  }
   0xf   : > { %p1588_p6 = pnand %p1186_p4, %p44_p1  ;;  %s203_s16 = sshll.u32 %s1499_s15, 4  ;;  %s204_s16 = int_to_ptr.vmem [resolvable:$true] %s203_s16 }
  0x10   : > { %s1500_s17 = smov 64   ;;  %s1501_s22 = smov 4  }
  0x11   : > { %1189 = dma.hbm_to_vmem [thread:$0]  (!%p1588_p6), %s176_s24, 1024, %s178_s28, [#allocation6], %s1497_s13, %s1497_s13, %s1498_s14  }
  0x12   : > { %1192 = dma.hbm_to_vmem [thread:$0]  (!%p1588_p6), %s191_s6, 32, %s193_s12, [#allocation6]  }
  0x13   : > { %1195 = dma.hbm_to_vmem [thread:$0]  (!%p1588_p6), %s202_s10, 512, %s204_s16, [#allocation9], %s1500_s17, %s1500_s17, %s1501_s22  }
  0x14   : > { %s1073_s23 = sadd.s32 4294967294, %s1493_s21   ;;  %s1603_s24 = sadd.s32 1, %s1493_s21  }
  0x15   : > { %s30_s27 = sadd.s32 1, %s1489_s20  ;;  %s27_s28 = ssub.s32 %s1493_s21, %s1603_s24 }
  0x16   : > { %p37_p7 = scmp.ne.s32.totalorder %s1489_s20, %s1485_s19  ;;  %p28_p8 = scmp.eq.s32.totalorder %s27_s28, 0 }
  0x17   : > { %p38_p9 = scmp.eq.s32.totalorder %s1493_s21, 0  ;;  %p43_p10 = scmp.ne.s32.totalorder %s1485_s19, %s1481_s18 }
  0x18   : > { %p151_p11 = scmp.eq.s32.totalorder %s1571_s25, 1  ;;  %p157_p0 = scmp.eq.s32.totalorder %s1073_s23, 1 }
  0x19   : > { %s1615_s29 = scalar_select %p28_p8, %s1489_s20, %s30_s27  }
  0x1a   : > { %p1619_p12 = por %p44_p1, %p43_p10  ;;  %p1623_p13 = por %p151_p11, %p37_p7 }
  0x1b   : > { %p39_p2 = por %p38_p9, %p37_p7  ;;  %s220_s7 = sand.u32 1, %s1489_s20  }
  0x1c   : > { %p1628_p4 = por %p157_p0, %p43_p10  ;;  %p1207_p6 = scmp.lt.s32.totalorder %s1493_s21, 2 }
  0x1d   : > { %s1079_s9 = sshll.u32 %s220_s7, 3  ;;  %s1080_s10 = sshll.u32 %s1493_s21, 3 }
  0x1e   : > { %s228_s13 = scalar_lea.hbm %s1862_s0, %s1080_s10  ;;  %s224_s15 = scalar_lea.vmem [#allocation2], %s1079_s9 }
  0x1f   : > { %s230_s14 = sshll.u32 %s228_s13, 4  ;;  %s232_s16 = sshll.u32 %s224_s15, 4  ;;  %s231_s14 = int_to_ptr.hbm [resolvable:$true] %s230_s14  ;;  %s233_s16 = int_to_ptr.vmem [resolvable:$true] %s232_s16 }
  0x20   : > { %p1637_p8 = pnand %p1207_p6, %p39_p2  ;;  %s221_s22 = scalar_lea.sflag [#allocation3], %s220_s7 }
  0x21   : > { %s1389_s23 = sshra.s32 %s231_s14, 4  ;;  %s1396_s9 = scalar_lea.hbm %s1862_s0, 16  ;;  %s1390_s23 = int_to_ptr.hbm [resolvable:$true] %s1389_s23 }
  0x22   : > { %s1391_s27 = scalar_lea.hbm %s1390_s23, 8  ;;  %p1393_p9 = pneg %p1637_p8 }
  0x23   : > { %p1392_p7 = scmp.ne.s32.totalorder %s1390_s23, %s1391_s27  ;;  %p1397_p0 = scmp.lt.s32.totalorder %s1390_s23, %s1862_s0 }
  0x24   : > { %p1398_p2 = scmp.lt.s32.totalorder %s1396_s9, %s1391_s27 }
  0x25   : > { %p1394_p10 = pnand %p1393_p9, %p1392_p7 }
  0x26   : > { %p1399_p6 = por %p1398_p2, %p1397_p0 }
  0x27   : > { %p1395_p11 = pneg %p1394_p10 }
  0x29   : > { %p1400_p5 = pnand %p1399_p6, %p1395_p11 }
  0x2b   : > { %1403 = shalt.err (!%p1400_p5)
}
  0x2c   : > { %1199 = dma.hbm_to_vmem [thread:$0]  (!%p1637_p8), %s231_s14, 128, %s233_s16, %s221_s22  }
  0x2d   : > { %241 = sbr.rel (%p1576_p3) target bundleno = 1312 (0x520), region = 40  ;;  %s1654_s7 = sand.u32 (!%p1576_p3), 1, %s1485_s19  }
  0x2e   : > { %s1082_s13 = sshll.u32 (!%p1576_p3), %s1654_s7, 3  ;;  %s244_s15 = scalar_lea.sflag (!%p1576_p3), [#allocation3], %s1654_s7 }
  0x2f   : > { %s1660_s23 = scalar_lea.vmem (!%p1576_p3), [#allocation2], %s1082_s13 }
  0x32   : > { %1464 = dma.done.wait (%p1619_p12), %s244_s15, 128  }
  0x33   : > { %1466 = vsyncadd (%p1619_p12), %s244_s15, 4294967168 }
  0x34   : > { %1468 = dma.done.wait (%p44_p1), [#allocation6], 1056  }
  0x35   : > { %1470 = vsyncadd (%p44_p1), [#allocation6], 4294966240 }
  0x36   : > { %1472 = dma.done.wait (%p44_p1), [#allocation9], 512  }
  0x37   : > { %1474 = vsyncadd (%p44_p1), [#allocation9], 4294966784  ;;  %v1113_v0 = vld [vmem:[#allocation5 + $0x30] sm:$0xf]  ;;  %v1165_v1 = vld [vmem:[#allocation5 + $0x34] sm:$0xf0]  ;;  %v377_v58 = vlaneseq }
  0x38   : > { %v1105_v2 = vld [vmem:[#allocation5 + $0x20] sm:$0xf]  ;;  %v1114_v3 = vor.u32 %v1165_v1, %v1113_v0  ;;  %v1163_v4 = vld [vmem:[#allocation5 + $0x24] sm:$0xf0]  ;;  %v1164_v6 = vld [vmem:[#allocation5 + $0x34] sm:$0xf] }
  0x39   : > { %v1106_v5 = vor.u32 %v1163_v4, %v1105_v2  ;;  %v1115_v7 = vld [vmem:[#allocation5 + $0x38] sm:$0xf0]  ;;  %v1162_v8 = vld [vmem:[#allocation5 + $0x24] sm:$0xf]  ;;  %v1097_v9 = vld [vmem:[#allocation5 + $0x10] sm:$0xf] }
  0x3a   : > { %355 = vmatpush.bf16.msra.mxu0 %v1114_v3  ;;  %v1161_v10 = vld [vmem:[#allocation5 + $0x14] sm:$0xf0]  ;;  %v1118_v11 = vor.u32 %v1164_v6, %v1115_v7  ;;  %v1107_v12 = vld [vmem:[#allocation5 + $0x28] sm:$0xf0]  ;;  %v1160_v15 = vld [vmem:[#allocation5 + $0x14] sm:$0xf] }
  0x3b   : > { %v1110_v13 = vor.u32 %v1162_v8, %v1107_v12  ;;  %v1098_v14 = vor.u32 %v1161_v10, %v1097_v9  ;;  %v1099_v16 = vld [vmem:[#allocation5 + $0x18] sm:$0xf0]  ;;  %v1089_v17 = vld [vmem:[#allocation5] sm:$0xf]  ;;  %v1159_v18 = vld [vmem:[#allocation5 + $0x4] sm:$0xf0] }
  0x3c   : > { %368 = vmatpush.bf16.msra.mxu1 %v1118_v11  ;;  %v1102_v19 = vor.u32 %v1160_v15, %v1099_v16  ;;  %v1090_v20 = vor.u32 %v1159_v18, %v1089_v17  ;;  %v291_v21 = vld [vmem:[%s1660_s23] sm:$0xff]  ;;  %v1158_v22 = vld [vmem:[#allocation5 + $0x4] sm:$0xf]  ;;  %v1091_v23 = vld [vmem:[#allocation5 + $0x8] sm:$0xf0]  ;;  %vm347_vm0 = vcmask 523264  }
  0x3d   : > { %v292_v24 = vpack.c.bf16 %v291_v21, %v291_v21  ;;  %v1094_v25 = vor.u32 %v1158_v22, %v1091_v23  ;;  %v301_v26 = vld [vmem:[#allocation7] sm:$0x3]  ;;  %s1502_s26 = smov 40   ;;  %s1503_s30 = smov 56   ;;  %vm444_vm1 = vcmask 1043456   ;;  %vm410_vm2 = vcmask 64512  }
  0x3e   : > { %356 = vmatpush.bf16.msra.mxu0 %v1106_v5  ;;  %v303_v27 = vperm.slane %v301_v26, 0  ;;  %s1504_s14 = smov 64   ;;  %s1505_s16 = smov 104   ;;  %v304_v32 = vperm.slane %v301_v26, 1  ;;  %v378_v59 = vshrl.u32 %v377_v58, 7  ;;  %v380_v60 = vand.u32 127, %v377_v58 }
  0x3f   : > { %s1506_s17 = smov 120   ;;  %s1507_s22 = smov 24  }
  0x40   : > { %369 = vmatpush.bf16.msra.mxu1 %v1110_v13  ;;  %s1508_s27 = smov 48   ;;  %s1509_s28 = smov 88   ;;  %v381_v61 = vsub.s32 %v378_v59, %v380_v60 }
  0x41   : > { %s1510_s10 = smov 112   ;;  %s1511_s9 = smov 8  }
  0x42   : > { %357 = vmatpush.bf16.msra.mxu0 %v1098_v14  ;;  %s1512_s11 = smov 32   ;;  %s1513_s12 = smov 72   ;;  %v383_v62 = vsub.s32 0, %v381_v61  ;;  %vm382_vm3 = vcmp.lt.s32.totalorder %v381_v61, 0 }
  0x43   : > { %s1514_s15 = smov 96   ;;  %s1515_s23 = smov 80  }
  0x44   : > { %370 = vmatpush.bf16.msra.mxu1 %v1102_v19  ;;  %v1718_v63 = vsel %vm382_vm3, %v383_v62, %v381_v61 }
  0x45   : > { %v386_v0 = vand.u32 1, %v1718_v63  ;;  %vm385_vm4 = vcmp.le.s32.totalorder %v1718_v63, 1  ;;  %v394_v2 = vand.u32 7, %v1718_v63  ;;  %vm393_vm7 = vcmp.le.s32.totalorder %v1718_v63, 4 }
  0x46   : > { %358 = vmatpush.bf16.msra.mxu0 %v1090_v20  ;;  %vm389_vm10 = vcmp.le.s32.totalorder %v1718_v63, 2  ;;  %vm401_vm13 = vcmp.le.s32.totalorder %v1718_v63, 16  ;;  %vm397_vm3 = vcmp.le.s32.totalorder %v1718_v63, 8 }
  0x47   : > { %vm387_vm5 = vcmp.eq.s32.totalorder %v386_v0, 0  ;;  %vm395_vm8 = vcmp.eq.s32.totalorder %v394_v2, 0 }
  0x48   : > { %371 = vmatpush.bf16.msra.mxu1 %v1094_v25  ;;  %vm388_vm6 = vmor %vm385_vm4, %vm387_vm5 }
  0x49   : > { %1119 = vmatmul.msk.bf16.vlgmr.msra.gmra.mxu0 %vm347_vm0, %v292_v24  ;;  %vm396_vm9 = vmor %vm393_vm7, %vm395_vm8  ;;  %vm896_vm7 = vcmask 261120   ;;  %vm898_vm8 = vcmask 326656  }
  0x4b   : > { %1120 = vmatmul.msk.bf16.vlgmr.msra.gmra.mxu1 %vm347_vm0, %v292_v24 }
  0xc6   : > { %v360_v28 = vpop.f32.mrf.mxu0 }
  0xc7   : > { %v361_v29 = vadd.f32 %v360_v28, %v303_v27 }
  0xc8   : > { %v373_v33 = vpop.f32.mrf.mxu1 }
  0xc9   : > { %v405_v30 = vpack.c.bf16 %v361_v29, %v361_v29  ;;  %v374_v34 = vadd.f32 %v373_v33, %v304_v32 }
  0xcb   : > { %580 = vrot.lane.b32.xlu2 %v405_v30, %s1502_s26  ;;  %465 = vrot.lane.b32.xlu1 %v405_v30, %s1503_s30  ;;  %v1689_v35 = vpack.c.bf16 %v374_v34, %v374_v34 }
  0xcc   : > { %408 = vrot.lane.b32.xlu0 %v405_v30, %s1504_s14  ;;  %s1516_s14 = smov 16  }
  0xcd   : > { %v446_v36 = vsel %vm444_vm1, %v1689_v35, 0 }
  0xce   : > { %v362_v31 = vpop.f32.mrf.mxu0  ;;  %455 = vmatpush.bf16.msra.mxu3 %v446_v36 }
  0xd0   : > { %v375_v37 = vpop.f32.mrf.mxu1 }
  0xd1   : > { %v390_v37 = vand.u32 3, %v1718_v63 }
  0xd3   : > { %578 = vrot.lane.b32.xlu2 %v405_v30, %s1505_s16  ;;  %463 = vrot.lane.b32.xlu1 %v405_v30, %s1506_s17  ;;  %vm391_vm11 = vcmp.eq.s32.totalorder %v390_v37, 0 }
  0xd4   : > { %vm392_vm12 = vmor %vm389_vm10, %vm391_vm11  ;;  %vm902_vm10 = vcmask 457728  }
  0xdb   : > { %694 = vrot.lane.b32.xlu2 %v405_v30, %s1507_s22  ;;  %523 = vrot.lane.b32.xlu1 %v405_v30, %s1508_s27 }
  0xe3   : > { %692 = vrot.lane.b32.xlu2 %v405_v30, %s1509_s28  ;;  %521 = vrot.lane.b32.xlu1 %v405_v30, %s1510_s10 }
  0xeb   : > { %808 = vrot.lane.b32.xlu2 %v405_v30, %s1511_s9  ;;  %637 = vrot.lane.b32.xlu1 %v405_v30, %s1512_s11 }
  0xf3   : > { %806 = vrot.lane.b32.xlu2 %v405_v30, %s1513_s12  ;;  %635 = vrot.lane.b32.xlu1 %v405_v30, %s1514_s15 }
  0xfb   : > { %749 = vrot.lane.b32.xlu2 %v405_v30, %s1515_s23  ;;  %751 = vrot.lane.b32.xlu1 %v405_v30, %s1516_s14 }
 0x103   : > { %498 = vrot.lane.b32.xlu1 %v1689_v35, %s1506_s17 }
 0x10b   : > { %612 = vrot.lane.b32.xlu1 %v1689_v35, %s1505_s16 }
 0x113   : > { %669 = vrot.lane.b32.xlu1 %v1689_v35, %s1514_s15 }
 0x125   : > { %v1697_v38 = vpop.permute.xlu2 %580 }
 0x126   : > { %v586_v20 = vsel %vm410_vm2, %v1697_v38, 0 }
 0x12d   : > { %v1701_v43 = vpop.permute.xlu2 %578 }
 0x135   : > { %v1706_v45 = vpop.permute.xlu2 %694 }
 0x136   : > { %v700_v26 = vsel %vm410_vm2, %v1706_v45, 0 }
 0x13d   : > { %v466_v39 = vpop.permute.xlu1 %465  ;;  %v1710_v49 = vpop.permute.xlu2 %692 }
 0x13e   : > { %v409_v40 = vpop.permute.xlu0 %408  ;;  %v471_v41 = vsel %vm410_vm2, %v466_v39, 0  ;;  %v402_v39 = vand.u32 31, %v1718_v63 }
 0x13f   : > { %v415_v42 = vsel %vm410_vm2, %v409_v40, 0  ;;  %480 = vmatpush.bf16.xpose.msrb.mxu3 %v471_v41 }
 0x140   : > { %424 = vmatpush.bf16.xpose.msra.mxu2 %v415_v42  ;;  %vm403_vm14 = vcmp.eq.s32.totalorder %v402_v39, 0 }
 0x141   : > { %vm1764_vm15 = vmor %vm401_vm13, %vm403_vm14 }
 0x145   : > { %v1703_v44 = vpop.permute.xlu1 %463  ;;  %v809_v52 = vpop.permute.xlu2 %808 }
 0x146   : > { %v814_v28 = vsel %vm410_vm2, %v809_v52, 0 }
 0x147   : > { %1121 = vmatmul.msk.bf16.vlgmr.msra.gmra.mxu2 %vm410_vm2, %v405_v30 }
 0x14d   : > { %v524_v46 = vpop.permute.xlu1 %523  ;;  %v1714_v54 = vpop.permute.xlu2 %806 }
 0x14e   : > { %v529_v47 = vsel %vm410_vm2, %v524_v46, 0 }
 0x14f   : > { %538 = vmatpush.bf16.xpose.msrb.mxu0 %v529_v47  ;;  %v398_v47 = vand.u32 15, %v1718_v63 }
 0x151   : > { %vm399_vm4 = vcmp.eq.s32.totalorder %v398_v47, 0 }
 0x152   : > { %vm400_vm5 = vmor %vm397_vm3, %vm399_vm4 }
 0x155   : > { %v522_v48 = vpop.permute.xlu1 %521  ;;  %v750_v57 = vpop.permute.xlu2 %749 }
 0x156   : > { %1125 = vmatmul.msk.bf16.vlgmr.msrb.gmra.mxu0 %vm410_vm2, %v522_v48 }
 0x15d   : > { %v638_v50 = vpop.permute.xlu1 %637 }
 0x15e   : > { %v643_v51 = vsel %vm410_vm2, %v638_v50, 0 }
 0x15f   : > { %652 = vmatpush.bf16.xpose.msra.mxu0 %v643_v51 }
 0x165   : > { %v636_v53 = vpop.permute.xlu1 %635 }
 0x166   : > { %1129 = vmatmul.msk.bf16.vlgmr.msra.gmra.mxu0 %vm410_vm2, %v636_v53 }
 0x16d   : > { %v752_v55 = vpop.permute.xlu1 %751 }
 0x16e   : > { %v757_v56 = vsel %vm410_vm2, %v752_v55, 0 }
 0x16f   : > { %766 = vmatpush.bf16.xpose.msrb.mxu0 %v757_v56 }
 0x175   : > { %v499_v29 = vpop.permute.xlu1 %498 }
 0x176   : > { %1133 = vmatmul.msk.bf16.vlgmr.msrb.gmra.mxu0 %vm410_vm2, %v750_v57  ;;  %v504_v30 = vsel %vm444_vm1, %v499_v29, 0 }
 0x177   : > { %513 = vmatpush.bf16.msrb.mxu2 %v504_v30 }
 0x17d   : > { %v613_v31 = vpop.permute.xlu1 %612 }
 0x17e   : > { %v618_v32 = vsel %vm444_vm1, %v613_v31, 0 }
 0x17f   : > { %627 = vmatpush.bf16.msra.mxu2 %v618_v32 }
 0x185   : > { %v670_v33 = vpop.permute.xlu1 %669 }
 0x186   : > { %v675_v34 = vsel %vm444_vm1, %v670_v33, 0 }
 0x1ca   : > { %v426_v1 = vpop.f32.mrf.mxu2 }
 0x1cb   : > { %v430_v3 = vsel %vm388_vm6, %v426_v1, -1e+30  ;;  %vm894_vm6 = vcmask 195584  }
 0x1cc   : > { %v431_v4 = vsel %vm410_vm2, %v430_v3, -inf }
 0x1cd   : > { %432 = vmax.xlane.f32.xlu0 %v431_v4 }
 0x1d2   : > { %v428_v5 = vpop.f32.mrf.mxu2 }
 0x1d3   : > { %v540_v6 = vpop.f32.mrf.mxu0 }
 0x1d4   : > { %v544_v7 = vsel %vm396_vm9, %v540_v6, -1e+30  ;;  %vm900_vm9 = vcmask 392192  }
 0x1d5   : > { %v545_v8 = vsel %vm410_vm2, %v544_v7, -inf }
 0x1d6   : > { %546 = vmax.xlane.f32.xlu0 %v545_v8 }
 0x1db   : > { %v542_v9 = vpop.f32.mrf.mxu0 }
 0x1e3   : > { %v654_v10 = vpop.f32.mrf.mxu0 }
 0x1e4   : > { %v658_v46 = vsel %vm1764_vm15, %v654_v10, -1e+30 }
 0x1ea   : > { %555 = vrot.lane.b32.xlu0 %v1689_v35, %s1510_s10 }
 0x1eb   : > { %v656_v11 = vpop.f32.mrf.mxu0 }
 0x1f3   : > { %v768_v12 = vpop.f32.mrf.mxu0 }
 0x1f4   : > { %v772_v50 = vsel %vm1764_vm15, %v768_v12, -1e+30 }
 0x1f5   : > { %v773_v53 = vsel %vm410_vm2, %v772_v50, -inf }
 0x1fb   : > { %v770_v13 = vpop.f32.mrf.mxu0 }
 0x240   : > { %v433_v14 = vpop.xlane.xlu0 %432 }
 0x241   : > { %v434_v15 = vsub.f32 %v430_v3, %v433_v14 }
 0x243   : > { %v435_v16 = vmul.f32 1.442695, %v434_v15 }
 0x245   : > { %1267 = vpow2.f32 %v435_v16 }
 0x249   : > { %v547_v18 = vpop.xlane.xlu0 %546 }
 0x24a   : > { %v548_v21 = vsub.f32 %v544_v7, %v547_v18 }
 0x24b   : > { %v1728_v17 = vpop.eup %1267 }
 0x24c   : > { %v440_v19 = vpack.c.bf16 %v1728_v17, %v1728_v17  ;;  %v549_v22 = vmul.f32 1.442695, %v548_v21 }
 0x24e   : > { %1122 = vmatmul.msk.bf16.vlgmr.msra.gmra.mxu3 %vm410_vm2, %v440_v19  ;;  %1269 = vpow2.f32 %v549_v22 }
 0x24f   : > { %595 = vmatpush.bf16.xpose.msra.mxu3 %v586_v20 }
 0x254   : > { %v1735_v23 = vpop.eup %1269 }
 0x255   : > { %v554_v27 = vpack.c.bf16 %v1735_v23, %v1735_v23  ;;  %v551_v63 = vsel %vm410_vm2, %v1735_v23, 0.0 }
 0x25c   : > { %v556_v24 = vpop.permute.xlu0 %555 }
 0x25d   : > { %v561_v25 = vsel %vm444_vm1, %v556_v24, 0 }
 0x25e   : > { %1123 = vmatmul.msk.bf16.vlgmr.msrb.gmra.mxu3 %vm410_vm2, %v1703_v44  ;;  %570 = vmatpush.bf16.msrb.mxu1 %v561_v25 }
 0x25f   : > { %709 = vmatpush.bf16.xpose.msrb.mxu3 %v700_v26 }
 0x261   : > { %1126 = vmatmul.msk.bf16.vlgmr.msrb.gmra.mxu1 %vm410_vm2, %v554_v27 }
 0x262   : > { %684 = vmatpush.bf16.msra.mxu1 %v675_v34  ;;  %v437_v34 = vsel %vm410_vm2, %v1728_v17, 0.0 }
 0x26e   : > { %1127 = vmatmul.msk.bf16.vlgmr.msra.gmra.mxu3 %vm410_vm2, %v1701_v43 }
 0x26f   : > { %823 = vmatpush.bf16.xpose.msra.mxu3 %v814_v28 }
 0x27e   : > { %1131 = vmatmul.msk.bf16.vlgmr.msrb.gmra.mxu3 %vm410_vm2, %v1710_v49  ;;  %v659_v49 = vsel %vm410_vm2, %v658_v46, -inf }
 0x28e   : > { %1135 = vmatmul.msk.bf16.vlgmr.msra.gmra.mxu3 %vm410_vm2, %v1714_v54 }
 0x2d1   : > { %v1755_v36 = vpop.f32.mrf.mxu3 }
 0x2d9   : > { %v459_v38 = vpop.f32.mrf.mxu3 }
 0x2de   : > { %v1760_v40 = vpop.f32.mrf.mxu1 }
 0x2e1   : > { %v482_v41 = vpop.f32.mrf.mxu3 }
 0x2e2   : > { %v486_v42 = vsel %vm392_vm12, %v482_v41, -1e+30 }
 0x2e3   : > { %v487_v43 = vsel %vm410_vm2, %v486_v42, -inf }
 0x2e4   : > { %488 = vmax.xlane.f32.xlu0 %v487_v43 }
 0x2e6   : > { %v574_v45 = vpop.f32.mrf.mxu1 }
 0x2e9   : > { %v484_v48 = vpop.f32.mrf.mxu3 }
 0x2ec   : > { %660 = vmax.xlane.f32.xlu0 %v659_v49 }
 0x2f1   : > { %v597_v51 = vpop.f32.mrf.mxu3 }
 0x2f2   : > { %v601_v52 = vsel %vm400_vm5, %v597_v51, -1e+30 }
 0x2f3   : > { %v602_v54 = vsel %vm410_vm2, %v601_v52, -inf }
 0x2f4   : > { %774 = vmax.xlane.f32.xlu0 %v773_v53  ;;  %603 = vmax.xlane.f32.xlu2 %v602_v54 }
 0x2f9   : > { %v599_v55 = vpop.f32.mrf.mxu3 }
 0x301   : > { %v711_v56 = vpop.f32.mrf.mxu3 }
 0x302   : > { %v715_v57 = vsel %vm1764_vm15, %v711_v56, -1e+30 }
 0x303   : > { %v716_v58 = vsel %vm410_vm2, %v715_v57, -inf }
 0x304   : > { %717 = vmax.xlane.f32.xlu1 %v716_v58 }
 0x308   : > { %840 = vrot.lane.b32.xlu0 %v1689_v35, %s1513_s12 }
 0x309   : > { %v713_v59 = vpop.f32.mrf.mxu3 }
 0x30c   : > { %726 = vrot.lane.b32.xlu2 %v1689_v35, %s1509_s28  ;;  %s289_s28 = scalar_lea.vmem [#allocation10], %s1082_s13  ;;  %s1439_s13 = scalar_lea.hbm %s1867_s5, 16 }
 0x30d   : > { %s971_s10 = sshll.u32 %s289_s28, 4  ;;  %s972_s10 = int_to_ptr.vmem [resolvable:$true] %s971_s10 }
 0x311   : > { %v825_v60 = vpop.f32.mrf.mxu3 }
 0x312   : > { %v1788_v62 = vsel %vm1764_vm15, %v825_v60, -1e+30 }
 0x313   : > { %v830_v0 = vsel %vm410_vm2, %v1788_v62, -inf }
 0x319   : > { %v827_v61 = vpop.f32.mrf.mxu3 }
 0x31d   : > { %783 = vrot.lane.b32.xlu1 %v1689_v35, %s1515_s23 }
 0x332   : > { %552 = vadd.xlane.f32.xlu0 %v551_v63 }
 0x335   : > { %831 = vmax.xlane.f32.xlu2 %v830_v0 }
 0x357   : > { %v489_v1 = vpop.xlane.xlu0 %488 }
 0x358   : > { %v490_v2 = vsub.f32 %v486_v42, %v489_v1 }
 0x35a   : > { %v491_v3 = vmul.f32 1.442695, %v490_v2 }
 0x35c   : > { %1271 = vpow2.f32 %v491_v3 }
 0x35f   : > { %v661_v4 = vpop.xlane.xlu0 %660 }
 0x360   : > { %v662_v5 = vsub.f32 %v658_v46, %v661_v4 }
 0x362   : > { %v1272_v6 = vpop.eup %1271  ;;  %v663_v35 = vmul.f32 1.442695, %v662_v5 }
 0x363   : > { %v493_v7 = vsel %vm410_vm2, %v1272_v6, 0.0  ;;  %v496_v8 = vpack.c.bf16 %v1272_v6, %v1272_v6 }
 0x364   : > { %1273 = vpow2.f32 %v663_v35  ;;  %494 = vadd.xlane.f32.xlu1 %v493_v7 }
 0x365   : > { %1124 = vmatmul.msk.bf16.vlgmr.msrb.gmra.mxu2 %vm410_vm2, %v496_v8 }
 0x367   : > { %v604_v9 = vpop.xlane.xlu2 %603  ;;  %v775_v10 = vpop.xlane.xlu0 %774 }
 0x368   : > { %v605_v11 = vsub.f32 %v601_v52, %v604_v9  ;;  %v776_v12 = vsub.f32 %v772_v50, %v775_v10 }
 0x36a   : > { %v1274_v13 = vpop.eup %1273  ;;  %v606_v14 = vmul.f32 1.442695, %v605_v11  ;;  %v777_v15 = vmul.f32 1.442695, %v776_v12 }
 0x36b   : > { %v668_v16 = vpack.c.bf16 %v1274_v13, %v1274_v13  ;;  %v665_v18 = vsel %vm410_vm2, %v1274_v13, 0.0  ;;  %v1169_v13 = vld [vmem:[#allocation8 + $0x18] sm:$0xff] }
 0x36c   : > { %1275 = vpow2.f32 %v606_v14  ;;  %666 = vadd.xlane.f32.xlu2 %v665_v18  ;;  %948 = vmatpush.bf16.msra.mxu0 %v1169_v13  ;;  %v1168_v14 = vld [vmem:[#allocation8 + $0x10] sm:$0xff] }
 0x36d   : > { %1277 = vpow2.f32 %v777_v15  ;;  %1130 = vmatmul.msk.bf16.vlgmr.msra.gmra.mxu1 %vm410_vm2, %v668_v16  ;;  %v1167_v15 = vld [vmem:[#allocation8 + $0x8] sm:$0xff]  ;;  %v1166_v16 = vld [vmem:[#allocation8] sm:$0xff] }
 0x36f   : > { %v727_v19 = vpop.permute.xlu2 %726 }
 0x370   : > { %v732_v20 = vsel %vm444_vm1, %v727_v19, 0  ;;  %949 = vmatpush.bf16.msra.mxu0 %v1168_v14 }
 0x371   : > { %741 = vmatpush.bf16.msrb.mxu2 %v732_v20 }
 0x372   : > { %v1276_v21 = vpop.eup %1275 }
 0x373   : > { %v1278_v22 = vpop.eup %1277  ;;  %v611_v23 = vpack.c.bf16 %v1276_v21, %v1276_v21  ;;  %v608_v30 = vsel %vm410_vm2, %v1276_v21, 0.0 }
 0x374   : > { %v779_v24 = vsel %vm410_vm2, %v1278_v22, 0.0  ;;  %v782_v39 = vpack.c.bf16 %v1278_v22, %v1278_v22  ;;  %950 = vmatpush.bf16.msra.mxu0 %v1167_v15 }
 0x375   : > { %780 = vadd.xlane.f32.xlu2 %v779_v24  ;;  %1128 = vmatmul.msk.bf16.vlgmr.msra.gmra.mxu2 %vm410_vm2, %v611_v23 }
 0x377   : > { %v718_v25 = vpop.xlane.xlu1 %717 }
 0x378   : > { %v719_v26 = vsub.f32 %v715_v57, %v718_v25  ;;  %951 = vmatpush.bf16.msra.mxu0 %v1166_v16 }
 0x37a   : > { %v720_v27 = vmul.f32 1.442695, %v719_v26  ;;  %v841_v28 = vpop.permute.xlu0 %840 }
 0x37b   : > { %v846_v29 = vsel %vm444_vm1, %v841_v28, 0 }
 0x37c   : > { %1279 = vpow2.f32 %v720_v27  ;;  %855 = vmatpush.bf16.msra.mxu2 %v846_v29 }
 0x37d   : > { %609 = vadd.xlane.f32.xlu2 %v608_v30 }
 0x382   : > { %v1280_v31 = vpop.eup %1279 }
 0x383   : > { %v725_v32 = vpack.c.bf16 %v1280_v31, %v1280_v31  ;;  %v722_v33 = vsel %vm410_vm2, %v1280_v31, 0.0 }
 0x385   : > { %723 = vadd.xlane.f32.xlu2 %v722_v33  ;;  %1132 = vmatmul.msk.bf16.vlgmr.msrb.gmra.mxu2 %vm410_vm2, %v725_v32 }
 0x38d   : > { %438 = vadd.xlane.f32.xlu2 %v437_v34 }
 0x38f   : > { %v784_v37 = vpop.permute.xlu1 %783 }
 0x390   : > { %v789_v38 = vsel %vm444_vm1, %v784_v37, 0  ;;  %vm892_vm1 = vcmask 130048   ;;  %v1266_v37 = vld [vmem:[%s1866_s4] ss:$0 sm:$0xff] }
 0x391   : > { %798 = vmatpush.bf16.msrb.mxu1 %v789_v38 }
 0x394   : > { %1134 = vmatmul.msk.bf16.vlgmr.msrb.gmra.mxu1 %vm410_vm2, %v782_v39 }
 0x3a5   : > { %v553_v41 = vpop.xlane.xlu0 %552 }
 0x3a6   : > { %1281 = vrcp.f32 %v553_v41 }
 0x3a8   : > { %v832_v42 = vpop.xlane.xlu2 %831 }
 0x3a9   : > { %v833_v43 = vsub.f32 %v1788_v62, %v832_v42 }
 0x3ab   : > { %v834_v44 = vmul.f32 1.442695, %v833_v43 }
 0x3ac   : > { %v1282_v45 = vpop.eup %1281 }
 0x3ad   : > { %1283 = vpow2.f32 %v834_v44  ;;  %v577_v46 = vmul.f32 %v1282_v45, %v1760_v40 }
 0x3af   : > { %868 = vrot.lane.b32.xlu0 %v577_v46, %s1516_s14 }
 0x3b3   : > { %v1284_v17 = vpop.eup %1283 }
 0x3b4   : > { %v839_v47 = vpack.c.bf16 %v1284_v17, %v1284_v17  ;;  %v836_v48 = vsel %vm410_vm2, %v1284_v17, 0.0 }
 0x3b5   : > { %837 = vadd.xlane.f32.xlu1 %v836_v48 }
 0x3b6   : > { %1136 = vmatmul.msk.bf16.vlgmr.msra.gmra.mxu2 %vm410_vm2, %v839_v47 }
 0x3d7   : > { %v495_v49 = vpop.xlane.xlu1 %494 }
 0x3d8   : > { %1285 = vrcp.f32 %v495_v49 }
 0x3de   : > { %v1286_v51 = vpop.eup %1285 }
 0x3df   : > { %v667_v50 = vpop.xlane.xlu2 %666 }
 0x3e0   : > { %1287 = vrcp.f32 %v667_v50 }
 0x3e6   : > { %v1288_v55 = vpop.eup %1287 }
 0x3e8   : > { %v781_v52 = vpop.xlane.xlu2 %780  ;;  %v515_v53 = vpop.f32.mrf.mxu2 }
 0x3e9   : > { %v520_v54 = vmul.f32 %v1286_v51, %v515_v53 }
 0x3ea   : > { %v686_v56 = vpop.f32.mrf.mxu1 }
 0x3eb   : > { %v691_v40 = vmul.f32 %v1288_v55, %v686_v56  ;;  %864 = vrot.lane.b32.xlu1 %v520_v54, %s1511_s9 }
 0x3ed   : > { %876 = vrot.lane.b32.xlu0 %v691_v40, %s1512_s11 }
 0x3f0   : > { %v610_v57 = vpop.xlane.xlu2 %609  ;;  %v517_v58 = vpop.f32.mrf.mxu2 }
 0x3f1   : > { %1289 = vrcp.f32 %v610_v57 }
 0x3f2   : > { %v688_v59 = vpop.f32.mrf.mxu1 }
 0x3f7   : > { %v1290_v60 = vpop.eup %1289 }
 0x3f8   : > { %v629_v61 = vpop.f32.mrf.mxu2  ;;  %v724_v63 = vpop.xlane.xlu2 %723 }
 0x3f9   : > { %v634_v62 = vmul.f32 %v1290_v60, %v629_v61  ;;  %1291 = vrcp.f32 %v724_v63 }
 0x3fa   : > { %1293 = vrcp.f32 %v781_v52 }
 0x3fb   : > { %872 = vrot.lane.b32.xlu2 %v634_v62, %s1507_s22 }
 0x3ff   : > { %v1292_v1 = vpop.eup %1291 }
 0x400   : > { %v631_v0 = vpop.f32.mrf.mxu2  ;;  %v1294_v5 = vpop.eup %1293 }
 0x401   : > { %v439_v18 = vpop.xlane.xlu2 %438 }
 0x408   : > { %v743_v2 = vpop.f32.mrf.mxu2 }
 0x409   : > { %v748_v3 = vmul.f32 %v1292_v1, %v743_v2 }
 0x40b   : > { %880 = vrot.lane.b32.xlu1 %v748_v3, %s1502_s26  ;;  %s1155_s26 = sshll.u32 %s1571_s25, 3  ;;  %s959_s25 = scalar_lea.sflag [#allocation4], %s1654_s7 }
 0x40c   : > { %s969_s17 = scalar_lea.hbm %s1867_s5, %s1155_s26 }
 0x40d   : > { %s973_s9 = sshll.u32 %s969_s17, 4  ;;  %s974_s9 = int_to_ptr.hbm [resolvable:$true] %s973_s9 }
 0x40e   : > { %s1433_s11 = sshra.s32 %s974_s9, 4  ;;  %s1434_s11 = int_to_ptr.hbm [resolvable:$true] %s1433_s11 }
 0x40f   : > { %s1435_s12 = scalar_lea.hbm %s1434_s11, 8  ;;  %p1440_p12 = scmp.lt.s32.totalorder %s1434_s11, %s1867_s5 }
 0x410   : > { %v745_v4 = vpop.f32.mrf.mxu2  ;;  %p1436_p1 = scmp.ne.s32.totalorder %s1434_s11, %s1435_s12  ;;  %p1441_p8 = scmp.lt.s32.totalorder %s1439_s13, %s1435_s12 }
 0x411   : > { %v800_v6 = vpop.f32.mrf.mxu1 }
 0x412   : > { %v805_v35 = vmul.f32 %v1294_v5, %v800_v6  ;;  %p1437_p3 = pnand %p1436_p1, %p1623_p13  ;;  %p1442_p7 = por %p1441_p8, %p1440_p12 }
 0x414   : > { %884 = vrot.lane.b32.xlu0 %v805_v35, %s1508_s27  ;;  %p1438_p5 = pneg %p1437_p3 }
 0x416   : > { %p1443_p9 = pnand %p1442_p7, %p1438_p5 }
 0x419   : > { %v802_v7 = vpop.f32.mrf.mxu1 }
 0x421   : > { %v869_v19 = vpop.permute.xlu0 %868 }
 0x428   : > { %v838_v8 = vpop.xlane.xlu1 %837 }
 0x429   : > { %1295 = vrcp.f32 %v838_v8 }
 0x42a   : > { %1297 = vrcp.f32 %v439_v18 }
 0x42f   : > { %v1296_v9 = vpop.eup %1295 }
 0x430   : > { %v1298_v20 = vpop.eup %1297 }
 0x431   : > { %v462_v22 = vmul.f32 %v1298_v20, %v1755_v36 }
 0x439   : > { %v857_v10 = vpop.f32.mrf.mxu2 }
 0x43a   : > { %v862_v11 = vmul.f32 %v1296_v9, %v857_v10 }
 0x43c   : > { %888 = vrot.lane.b32.xlu2 %v862_v11, %s1503_s30 }
 0x441   : > { %v859_v12 = vpop.f32.mrf.mxu2 }
 0x455   : > { %v873_v25 = vpop.permute.xlu2 %872 }
 0x45d   : > { %v865_v21 = vpop.permute.xlu1 %864 }
 0x45e   : > { %v891_v23 = vsel %vm410_vm2, %v462_v22, %v865_v21 }
 0x45f   : > { %v877_v24 = vpop.permute.xlu0 %876  ;;  %v893_v26 = vsel %vm892_vm1, %v891_v23, %v869_v19 }
 0x460   : > { %v895_v27 = vsel %vm894_vm6, %v893_v26, %v873_v25 }
 0x461   : > { %v897_v30 = vsel %vm896_vm7, %v895_v27, %v877_v24 }
 0x47d   : > { %v881_v28 = vpop.permute.xlu1 %880 }
 0x47e   : > { %v899_v31 = vsel %vm898_vm8, %v897_v30, %v881_v28 }
 0x486   : > { %v885_v29 = vpop.permute.xlu0 %884 }
 0x487   : > { %v901_v32 = vsel %vm900_vm9, %v899_v31, %v885_v29 }
 0x496   : > { %v889_v36 = vpop.permute.xlu2 %888 }
 0x497   : > { %v903_v33 = vsel %vm902_vm10, %v901_v32, %v889_v36 }
 0x498   : > { %v904_v34 = vpack.c.bf16 %v903_v33, %v903_v33 }
 0x49a   : > { %1153 = vmatmul.msk.bf16.vlgmr.msra.gmra.mxu0 %vm347_vm0, %v904_v34 }
 0x517   : > { %v953_v38 = vpop.f32.mrf.mxu0 }
 0x518   : > { %v954_v39 = vadd.f32 %v1266_v37, %v953_v38 }
 0x51a   : > { %957 = vst.msk [vmem:[%s289_s28] sm:$0xff] %vm347_vm0, %v954_v39 }
 0x51b   : > { %1446 = shalt.err (!%p1443_p9)
}
 0x51c   : > { %1184 = dma.vmem_to_hbm [thread:$0]  (%p1623_p13), %s972_s10, 128, %s974_s9, %s959_s25  }
 0x51f   : > { %v955_v41 = vpop.f32.mrf.mxu0 }
 0x520 PF: > { %s985_s7 = sand.u32 1, %s1481_s18   ;;  %p1876_p10 = scmp.ge.s32.totalorder %s1493_s21, 2 }
 0x521   : > { %s986_s30 = scalar_lea.sflag [#allocation4], %s985_s7 }
 0x522   : > { %p1201_p11 = pnand %p1876_p10, %p1628_p4 }
 0x524   : > { %p1202_p0 = pneg %p1201_p11 }
 0x526   : > { %1476 = dma.done.wait (%p1202_p0), %s986_s30, 128  }
 0x527   : > { %1478 = vsyncadd (%p1202_p0), %s986_s30, 4294967168  ;;  %p20_p2 = scmp.ge.s32.totalorder %s1603_s24, 4   ;;  %s1877_s18 = smov %s1485_s19 }
 0x528   : > { %s1878_s19 = smov %s1489_s20  ;;  %s1879_s20 = smov %s1615_s29 }
 0x529   : > { %s1880_s21 = smov %s1603_s24  ;;  %22 = sbr.rel (!%p20_p2) target bundleno = 7 (0x7), region = 97 }
 0x52e   :  { %992 = vsyncpa [#allocation3], 1 }
 0x52f   :  { %994 = vsyncpa [#allocation3 + $0x1], 1 }
 0x530   :  { %995 = vsyncpa [#allocation6], 1 }
 0x531   :  { %996 = vsyncpa [#allocation9], 1 }
 0x532   :  { %997 = vsyncpa [#allocation4], 1 }
 0x533   :  { %999 = vsyncpa [#allocation4 + $0x1], 1 }

</bundles_post_ra>
